<compile_context>
chip_gen: v6e
topology: v6e:2x2x1
jax: 0.10.0
libtpu: 0.0.40
codegen_flags: <defaults>
</compile_context>

<pallas_src>
import math

import jax
import jax.numpy as jnp
from jax.experimental import pallas as pl
from jax.experimental.pallas import tpu as pltpu

# ----- model hyper-parameters (small, consistent with the module) -----
B = 2           # batch
S_TGT = 8       # target (decoder) sequence length
S_SRC = 16      # source (encoder memory) sequence length
D_MODEL = 32    # layer.size / d_model
N_HEADS = 4
D_HEAD = D_MODEL // N_HEADS
D_FF = 64
EPS = 1e-6
NEG_INF = -1e9

# ----- packed parameter-slab layout (all offsets static) -----
LANES = 128                         # lane width of both parameter slabs
OFF_W_QKV = 0                       # (D, 3D)  self-attn fused QKV (Q cols pre-scaled)
OFF_W_O_S = OFF_W_QKV + D_MODEL     # (D, D)   self-attn out projection
OFF_W_Q_C = OFF_W_O_S + D_MODEL     # (D, D)   cross-attn Q (pre-scaled)
OFF_W_KV  = OFF_W_Q_C + D_MODEL     # (D, 2D)  cross-attn fused KV
OFF_W_O_C = OFF_W_KV + D_MODEL      # (D, D)   cross-attn out projection
OFF_W_FF1 = OFF_W_O_C + D_MODEL     # (D, D_FF)
OFF_W_FF2 = OFF_W_FF1 + D_MODEL     # (D_FF, D)
W_ROWS    = OFF_W_FF2 + D_FF        # 256 rows total

# rows of the f32 bias / LayerNorm-parameter slab
(ROW_LN1_A, ROW_LN1_B, ROW_B_QKV, ROW_B_O_S,
 ROW_LN2_A, ROW_LN2_B, ROW_B_Q_C, ROW_B_KV, ROW_B_O_C,
 ROW_LN3_A, ROW_LN3_B, ROW_B_FF1, ROW_B_FF2) = range(13)
VEC_ROWS = 16


# ---------------------------------------------------------------------------
# In-kernel helpers
# ---------------------------------------------------------------------------
def _layernorm(x, a, b):
    """torch-style LayerNorm: a * (x - mean) / (std_unbiased + eps) + b (f32)."""
    d = x.shape[-1]
    mean = jnp.mean(x, axis=-1, keepdims=True)
    xc = x - mean
    var = jnp.sum(xc * xc, axis=-1, keepdims=True) * (1.0 / (d - 1))   # Bessel (torch.std)
    inv = pl.reciprocal(jnp.sqrt(var) + EPS, approx=True)              # EUP slot
    return a * (xc * inv) + b


def _attention(q2, k2, v2, bias, wo_heads, bo, sq, sk):
    """Multi-head attention + output projection.

    q2: (B*sq, D) f32 (Q already pre-scaled by 1/sqrt(Dh)), k2/v2: (B*sk, D) f32,
    bias: additive mask bias broadcastable to (B, H, sq, sk),
    wo_heads: (H, Dh, D) bf16 output-projection weights, bo: (1, D) f32.
    Returns (B*sq, D) f32 == concat_h(ctx_h) @ Wo + bo.
    """
    q = q2.reshape(B, sq, D_MODEL).astype(jnp.bfloat16)
    k = k2.reshape(B, sk, D_MODEL).astype(jnp.bfloat16)
    v = v2.reshape(B, sk, D_MODEL).astype(jnp.bfloat16)

    # All-head scores stacked on a leading head axis -> ONE bias add + ONE softmax.
    s = jnp.stack(
        [jnp.einsum('bqd,bkd->bqk',
                    q[..., h * D_HEAD:(h + 1) * D_HEAD],
                    k[..., h * D_HEAD:(h + 1) * D_HEAD],
                    preferred_element_type=jnp.float32)
         for h in range(N_HEADS)], axis=1)                          # (B, H, sq, sk)
    s = s + bias                                                    # head-independent
    s = s - jnp.max(s, axis=-1, keepdims=True)
    p = jnp.exp(s)
    p = p * pl.reciprocal(jnp.sum(p, axis=-1, keepdims=True), approx=True)
    p = p.astype(jnp.bfloat16)

    # Per-head contexts, merged with ONE head-batched output-projection einsum
    # plus a head-sum (mathematically identical to concat_h(ctx_h) @ Wo).
    ctx = jnp.stack(
        [jnp.einsum('bqk,bkd->bqd', p[:, h],
                    v[..., h * D_HEAD:(h + 1) * D_HEAD],
                    preferred_element_type=jnp.float32)
         for h in range(N_HEADS)], axis=0)                          # (H, B, sq, Dh)
    ctx = ctx.reshape(N_HEADS, B * sq, D_HEAD).astype(jnp.bfloat16)
    out = jnp.einsum('hnd,hde->hne', ctx, wo_heads,
                     preferred_element_type=jnp.float32)            # (H, B*sq, D)
    return jnp.sum(out, axis=0) + bo


# ---------------------------------------------------------------------------
# The fused decoder-layer kernel (single invocation, everything resident in VMEM)
# ---------------------------------------------------------------------------
def decoder_layer_kernel(x_ref, mem_ref, tgt_mask_ref, src_mask_ref,
                         w_ref, v_ref, o_ref):
    f32 = jnp.float32
    bf16 = jnp.bfloat16

    # ---- unpack the packed parameter slabs (static slices) ----
    def wslice(off, rows, cols):
        return w_ref[off:off + rows, 0:cols].astype(bf16)

    w_qkv = wslice(OFF_W_QKV, D_MODEL, 3 * D_MODEL)                 # Q pre-scaled
    wo_s = w_ref[OFF_W_O_S:OFF_W_O_S + D_MODEL, 0:D_MODEL] \
        .reshape(N_HEADS, D_HEAD, D_MODEL).astype(bf16)
    wq_c = wslice(OFF_W_Q_C, D_MODEL, D_MODEL)                      # pre-scaled
    w_kv = wslice(OFF_W_KV, D_MODEL, 2 * D_MODEL)
    wo_c = w_ref[OFF_W_O_C:OFF_W_O_C + D_MODEL, 0:D_MODEL] \
        .reshape(N_HEADS, D_HEAD, D_MODEL).astype(bf16)
    w1 = wslice(OFF_W_FF1, D_MODEL, D_FF)
    w2 = wslice(OFF_W_FF2, D_FF, D_MODEL)

    def vrow(row, cols):
        return v_ref[row:row + 1, 0:cols]                           # (1, cols) f32

    ln1_a = vrow(ROW_LN1_A, D_MODEL); ln1_b = vrow(ROW_LN1_B, D_MODEL)
    b_qkv = vrow(ROW_B_QKV, 3 * D_MODEL)
    bo_s = vrow(ROW_B_O_S, D_MODEL)
    ln2_a = vrow(ROW_LN2_A, D_MODEL); ln2_b = vrow(ROW_LN2_B, D_MODEL)
    bq_c = vrow(ROW_B_Q_C, D_MODEL)
    b_kv = vrow(ROW_B_KV, 2 * D_MODEL)
    bo_c = vrow(ROW_B_O_C, D_MODEL)
    ln3_a = vrow(ROW_LN3_A, D_MODEL); ln3_b = vrow(ROW_LN3_B, D_MODEL)
    b1 = vrow(ROW_B_FF1, D_FF)
    b2 = vrow(ROW_B_FF2, D_MODEL)

    # ---- masks -> additive biases (head-independent, computed once) ----
    tgt_bias = jnp.where(tgt_mask_ref[...] == 0,
                         f32(NEG_INF), f32(0.0))[:, None]           # (B, 1, St, St)
    src_bias = jnp.where(src_mask_ref[...] == 0,
                         f32(NEG_INF), f32(0.0))[:, None]           # (B, 1, 1, Ss)

    x2 = x_ref[...]                                                 # (B*S_TGT, D) f32
    m2 = mem_ref[...]                                               # (B*S_SRC, D) f32

    # ---- sublayer 0: masked self-attention (pre-norm + residual) ----
    y2 = _layernorm(x2, ln1_a, ln1_b)
    qkv = jnp.dot(y2.astype(bf16), w_qkv,
                  preferred_element_type=f32) + b_qkv               # (n_tgt, 3D)
    x2 = x2 + _attention(qkv[:, :D_MODEL],
                         qkv[:, D_MODEL:2 * D_MODEL],
                         qkv[:, 2 * D_MODEL:],
                         tgt_bias, wo_s, bo_s, S_TGT, S_TGT)

    # ---- sublayer 1: source (cross) attention (pre-norm + residual) ----
    y2 = _layernorm(x2, ln2_a, ln2_b)
    q = jnp.dot(y2.astype(bf16), wq_c, preferred_element_type=f32) + bq_c
    kv = jnp.dot(m2.astype(bf16), w_kv,
                 preferred_element_type=f32) + b_kv                 # (n_src, 2D)
    x2 = x2 + _attention(q, kv[:, :D_MODEL], kv[:, D_MODEL:],
                         src_bias, wo_c, bo_c, S_TGT, S_SRC)

    # ---- sublayer 2: position-wise feed-forward (pre-norm + residual) ----
    y2 = _layernorm(x2, ln3_a, ln3_b)
    hdn = jnp.maximum(
        jnp.dot(y2.astype(bf16), w1, preferred_element_type=f32) + b1, 0.0)
    x2 = x2 + jnp.dot(hdn.astype(bf16), w2, preferred_element_type=f32) + b2

    o_ref[...] = x2


# ---------------------------------------------------------------------------
# One-time parameter packing (weight fusion, Q-scale folding, slab layout)
# ---------------------------------------------------------------------------
def pack_params(p):
    scale = 1.0 / math.sqrt(D_HEAD)
    w_qkv = jnp.concatenate([p["wq_s"] * scale, p["wk_s"], p["wv_s"]], axis=1)
    b_qkv = jnp.concatenate([p["bq_s"] * scale, p["bk_s"], p["bv_s"]], axis=1)
    w_kv = jnp.concatenate([p["wk_c"], p["wv_c"]], axis=1)
    b_kv = jnp.concatenate([p["bk_c"], p["bv_c"]], axis=1)

    w_slab = jnp.zeros((W_ROWS, LANES), jnp.float32)
    for off, w in ((OFF_W_QKV, w_qkv), (OFF_W_O_S, p["wo_s"]),
                   (OFF_W_Q_C, p["wq_c"] * scale), (OFF_W_KV, w_kv),
                   (OFF_W_O_C, p["wo_c"]), (OFF_W_FF1, p["w1"]),
                   (OFF_W_FF2, p["w2"])):
        w_slab = w_slab.at[off:off + w.shape[0], 0:w.shape[1]].set(w)

    v_slab = jnp.zeros((VEC_ROWS, LANES), jnp.float32)
    for row, v in ((ROW_LN1_A, p["ln1_a"]), (ROW_LN1_B, p["ln1_b"]),
                   (ROW_B_QKV, b_qkv), (ROW_B_O_S, p["bo_s"]),
                   (ROW_LN2_A, p["ln2_a"]), (ROW_LN2_B, p["ln2_b"]),
                   (ROW_B_Q_C, p["bq_c"] * scale), (ROW_B_KV, b_kv),
                   (ROW_B_O_C, p["bo_c"]),
                   (ROW_LN3_A, p["ln3_a"]), (ROW_LN3_B, p["ln3_b"]),
                   (ROW_B_FF1, p["b1"]), (ROW_B_FF2, p["b2"])):
        v_slab = v_slab.at[row:row + 1, 0:v.shape[1]].set(v)
    return w_slab, v_slab


# ---------------------------------------------------------------------------
# Wrapper: one pallas_call for the whole DecoderLayer forward
# ---------------------------------------------------------------------------
@jax.jit
def decoder_layer_forward(x, memory, src_mask, tgt_mask, w_slab, v_slab):
    """x: (B, S_TGT, D), memory: (B, S_SRC, D),
    src_mask: (B, 1, S_SRC) int, tgt_mask: (B, S_TGT, S_TGT) int."""
    Bb, St, Dd = x.shape
    Ss = memory.shape[1]
    vmem = pl.BlockSpec(memory_space=pltpu.MemorySpace.VMEM)
    out2d = pl.pallas_call(
        decoder_layer_kernel,
        out_shape=jax.ShapeDtypeStruct((Bb * St, Dd), jnp.float32),
        in_specs=[vmem] * 6,
        out_specs=vmem,
        input_output_aliases={0: 0},        # output reuses x's HBM buffer
    )(
        x.reshape(Bb * St, Dd),
        memory.reshape(Bb * Ss, Dd),
        tgt_mask.astype(jnp.int32),
        src_mask.astype(jnp.int32),
        w_slab, v_slab,
    )
    return out2d.reshape(Bb, St, Dd)


# ---------------------------------------------------------------------------
# Pure-JAX reference (exact f32 math, no Pallas) for a correctness check.
# ---------------------------------------------------------------------------
def _layernorm_ref(x, a, b):
    d = x.shape[-1]
    mean = jnp.mean(x, axis=-1, keepdims=True)
    xc = x - mean
    var = jnp.sum(xc * xc, axis=-1, keepdims=True) / (d - 1)
    std = jnp.sqrt(var)
    return a * xc / (std + EPS) + b


def reference_forward(x, memory, src_mask, tgt_mask, p):
    def mha(q_in, k_in, v_in, mask, wq, bq, wk, bk, wv, bv, wo, bo):
        Bq, Sq, _ = q_in.shape
        Sk = k_in.shape[1]
        q = q_in @ wq + bq
        k = k_in @ wk + bk
        v = v_in @ wv + bv
        qh = q.reshape(Bq, Sq, N_HEADS, D_HEAD).transpose(0, 2, 1, 3)
        kh = k.reshape(Bq, Sk, N_HEADS, D_HEAD).transpose(0, 2, 1, 3)
        vh = v.reshape(Bq, Sk, N_HEADS, D_HEAD).transpose(0, 2, 1, 3)
        s = jnp.einsum('bhqd,bhkd->bhqk', qh, kh) / math.sqrt(D_HEAD)
        m = mask[:, None, :, :]
        s = jnp.where(m == 0, NEG_INF, s)
        a = jax.nn.softmax(s, axis=-1)
        o = jnp.einsum('bhqk,bhkd->bhqd', a, vh)
        o = o.transpose(0, 2, 1, 3).reshape(Bq, Sq, D_MODEL)
        return o @ wo + bo

    y = _layernorm_ref(x, p["ln1_a"], p["ln1_b"])
    x = x + mha(y, y, y, tgt_mask,
                p["wq_s"], p["bq_s"], p["wk_s"], p["bk_s"], p["wv_s"], p["bv_s"],
                p["wo_s"], p["bo_s"])
    y = _layernorm_ref(x, p["ln2_a"], p["ln2_b"])
    x = x + mha(y, memory, memory, src_mask,
                p["wq_c"], p["bq_c"], p["wk_c"], p["bk_c"], p["wv_c"], p["bv_c"],
                p["wo_c"], p["bo_c"])
    y = _layernorm_ref(x, p["ln3_a"], p["ln3_b"])
    ff = jnp.maximum(y @ p["w1"] + p["b1"], 0.0) @ p["w2"] + p["b2"]
    return x + ff


# ---------------------------------------------------------------------------
def make_params(key):
    """Deterministic parameter init (shapes from the module's __init__)."""
    def linear(k, din, dout):
        k1, k2 = jax.random.split(k)
        bound = 1.0 / math.sqrt(din)
        w = jax.random.uniform(k1, (din, dout), jnp.float32, -bound, bound)
        b = jax.random.uniform(k2, (1, dout), jnp.float32, -bound, bound)
        return w, b

    keys = jax.random.split(key, 10)
    wq_s, bq_s = linear(keys[0], D_MODEL, D_MODEL)
    wk_s, bk_s = linear(keys[1], D_MODEL, D_MODEL)
    wv_s, bv_s = linear(keys[2], D_MODEL, D_MODEL)
    wo_s, bo_s = linear(keys[3], D_MODEL, D_MODEL)
    wq_c, bq_c = linear(keys[4], D_MODEL, D_MODEL)
    wk_c, bk_c = linear(keys[5], D_MODEL, D_MODEL)
    wv_c, bv_c = linear(keys[6], D_MODEL, D_MODEL)
    wo_c, bo_c = linear(keys[7], D_MODEL, D_MODEL)
    w1, b1 = linear(keys[8], D_MODEL, D_FF)
    w2, b2 = linear(keys[9], D_FF, D_MODEL)

    ones = jnp.ones((1, D_MODEL), jnp.float32)
    zeros = jnp.zeros((1, D_MODEL), jnp.float32)
    return dict(
        ln1_a=ones, ln1_b=zeros,
        wq_s=wq_s, bq_s=bq_s, wk_s=wk_s, bk_s=bk_s, wv_s=wv_s, bv_s=bv_s,
        wo_s=wo_s, bo_s=bo_s,
        ln2_a=ones, ln2_b=zeros,
        wq_c=wq_c, bq_c=bq_c, wk_c=wk_c, bk_c=bk_c, wv_c=wv_c, bv_c=bv_c,
        wo_c=wo_c, bo_c=bo_c,
        ln3_a=ones, ln3_b=zeros,
        w1=w1, b1=b1, w2=w2, b2=b2,
    )


if __name__ == "__main__":
    key = jax.random.PRNGKey(0)
    kx, km, kp = jax.random.split(key, 3)
    x = jax.random.normal(kx, (B, S_TGT, D_MODEL), jnp.float32)
    memory = jax.random.normal(km, (B, S_SRC, D_MODEL), jnp.float32)

    # tgt_mask: causal (subsequent) mask, (B, S_TGT, S_TGT)
    causal = jnp.tril(jnp.ones((S_TGT, S_TGT), jnp.int32))
    tgt_mask = jnp.broadcast_to(causal, (B, S_TGT, S_TGT))
    # src_mask: (B, 1, S_SRC); last 4 source positions of batch 1 are padding
    src_mask = jnp.ones((B, 1, S_SRC), jnp.int32).at[1, 0, -4:].set(0)

    params = make_params(kp)
    w_slab, v_slab = pack_params(params)      # one-time parameter prep

    out = jax.block_until_ready(
        decoder_layer_forward(x, memory, src_mask, tgt_mask, w_slab, v_slab))
    ref = jax.block_until_ready(
        reference_forward(x, memory, src_mask, tgt_mask, params))

    assert out.shape == (B, S_TGT, D_MODEL)
    max_err = float(jnp.max(jnp.abs(out - ref)))
    # bf16 MXU operands (f32 accumulation) + approx reciprocal => ~1e-2 error budget.
    assert jnp.allclose(out, ref, rtol=2e-2, atol=2e-2), f"max abs err {max_err}"

    print("KERNEL_OK")
</pallas_src>

<mosaic_0001>
module attributes {stable_mosaic.version = 11 : i64} {
  func.func @decoder_layer_kernel(%arg0: memref<16x32xf32, #tpu.memory_space<vmem>>, %arg1: memref<32x32xf32, #tpu.memory_space<vmem>>, %arg2: memref<2x8x8xi32, #tpu.memory_space<vmem>>, %arg3: memref<2x1x16xi32, #tpu.memory_space<vmem>>, %arg4: memref<256x128xf32, #tpu.memory_space<vmem>>, %arg5: memref<16x128xf32, #tpu.memory_space<vmem>>, %arg6: memref<16x32xf32, #tpu.memory_space<vmem>>) attributes {dimension_semantics = [], scalar_prefetch = 0 : i64, scratch_operands = 0 : i64, tpu.core_type = #tpu.core_type<tc>} {
    %c0 = arith.constant 0 : index
    %c0_0 = arith.constant 0 : index
    %0 = vector.load %arg4[%c0, %c0_0] : memref<256x128xf32, #tpu.memory_space<vmem>>, vector<32x96xf32>
    %1 = arith.truncf %0 : vector<32x96xf32> to vector<32x96xbf16>
    %c32 = arith.constant 32 : index
    %c0_1 = arith.constant 0 : index
    %2 = vector.load %arg4[%c32, %c0_1] : memref<256x128xf32, #tpu.memory_space<vmem>>, vector<32x32xf32>
    %3 = vector.shape_cast %2 : vector<32x32xf32> to vector<4x8x32xf32>
    %4 = arith.truncf %3 : vector<4x8x32xf32> to vector<4x8x32xbf16>
    %c64 = arith.constant 64 : index
    %c0_2 = arith.constant 0 : index
    %5 = vector.load %arg4[%c64, %c0_2] : memref<256x128xf32, #tpu.memory_space<vmem>>, vector<32x32xf32>
    %6 = arith.truncf %5 : vector<32x32xf32> to vector<32x32xbf16>
    %c96 = arith.constant 96 : index
    %c0_3 = arith.constant 0 : index
    %7 = vector.load %arg4[%c96, %c0_3] : memref<256x128xf32, #tpu.memory_space<vmem>>, vector<32x64xf32>
    %8 = arith.truncf %7 : vector<32x64xf32> to vector<32x64xbf16>
    %c128 = arith.constant 128 : index
    %c0_4 = arith.constant 0 : index
    %9 = vector.load %arg4[%c128, %c0_4] : memref<256x128xf32, #tpu.memory_space<vmem>>, vector<32x32xf32>
    %10 = vector.shape_cast %9 : vector<32x32xf32> to vector<4x8x32xf32>
    %11 = arith.truncf %10 : vector<4x8x32xf32> to vector<4x8x32xbf16>
    %c160 = arith.constant 160 : index
    %c0_5 = arith.constant 0 : index
    %12 = vector.load %arg4[%c160, %c0_5] : memref<256x128xf32, #tpu.memory_space<vmem>>, vector<32x64xf32>
    %13 = arith.truncf %12 : vector<32x64xf32> to vector<32x64xbf16>
    %c192 = arith.constant 192 : index
    %c0_6 = arith.constant 0 : index
    %14 = vector.load %arg4[%c192, %c0_6] : memref<256x128xf32, #tpu.memory_space<vmem>>, vector<64x32xf32>
    %15 = arith.truncf %14 : vector<64x32xf32> to vector<64x32xbf16>
    %c0_7 = arith.constant 0 : index
    %c0_8 = arith.constant 0 : index
    %16 = vector.load %arg5[%c0_7, %c0_8] : memref<16x128xf32, #tpu.memory_space<vmem>>, vector<1x32xf32>
    %c1 = arith.constant 1 : index
    %c0_9 = arith.constant 0 : index
    %17 = vector.load %arg5[%c1, %c0_9] : memref<16x128xf32, #tpu.memory_space<vmem>>, vector<1x32xf32>
    %c2 = arith.constant 2 : index
    %c0_10 = arith.constant 0 : index
    %18 = vector.load %arg5[%c2, %c0_10] : memref<16x128xf32, #tpu.memory_space<vmem>>, vector<1x96xf32>
    %c3 = arith.constant 3 : index
    %c0_11 = arith.constant 0 : index
    %19 = vector.load %arg5[%c3, %c0_11] : memref<16x128xf32, #tpu.memory_space<vmem>>, vector<1x32xf32>
    %c4 = arith.constant 4 : index
    %c0_12 = arith.constant 0 : index
    %20 = vector.load %arg5[%c4, %c0_12] : memref<16x128xf32, #tpu.memory_space<vmem>>, vector<1x32xf32>
    %c5 = arith.constant 5 : index
    %c0_13 = arith.constant 0 : index
    %21 = vector.load %arg5[%c5, %c0_13] : memref<16x128xf32, #tpu.memory_space<vmem>>, vector<1x32xf32>
    %c6 = arith.constant 6 : index
    %c0_14 = arith.constant 0 : index
    %22 = vector.load %arg5[%c6, %c0_14] : memref<16x128xf32, #tpu.memory_space<vmem>>, vector<1x32xf32>
    %c7 = arith.constant 7 : index
    %c0_15 = arith.constant 0 : index
    %23 = vector.load %arg5[%c7, %c0_15] : memref<16x128xf32, #tpu.memory_space<vmem>>, vector<1x64xf32>
    %c8 = arith.constant 8 : index
    %c0_16 = arith.constant 0 : index
    %24 = vector.load %arg5[%c8, %c0_16] : memref<16x128xf32, #tpu.memory_space<vmem>>, vector<1x32xf32>
    %c9 = arith.constant 9 : index
    %c0_17 = arith.constant 0 : index
    %25 = vector.load %arg5[%c9, %c0_17] : memref<16x128xf32, #tpu.memory_space<vmem>>, vector<1x32xf32>
    %c10 = arith.constant 10 : index
    %c0_18 = arith.constant 0 : index
    %26 = vector.load %arg5[%c10, %c0_18] : memref<16x128xf32, #tpu.memory_space<vmem>>, vector<1x32xf32>
    %c11 = arith.constant 11 : index
    %c0_19 = arith.constant 0 : index
    %27 = vector.load %arg5[%c11, %c0_19] : memref<16x128xf32, #tpu.memory_space<vmem>>, vector<1x64xf32>
    %c12 = arith.constant 12 : index
    %c0_20 = arith.constant 0 : index
    %28 = vector.load %arg5[%c12, %c0_20] : memref<16x128xf32, #tpu.memory_space<vmem>>, vector<1x32xf32>
    %c0_21 = arith.constant 0 : index
    %c0_22 = arith.constant 0 : index
    %c0_23 = arith.constant 0 : index
    %29 = vector.load %arg2[%c0_21, %c0_22, %c0_23] : memref<2x8x8xi32, #tpu.memory_space<vmem>>, vector<2x8x8xi32>
    %c0_i32 = arith.constant 0 : i32
    %30 = vector.broadcast %c0_i32 : i32 to vector<2x8x8xi32>
    %31 = arith.cmpi eq, %29, %30 : vector<2x8x8xi32>
    %cst = arith.constant -1.000000e+09 : f32
    %cst_24 = arith.constant 0.000000e+00 : f32
    %32 = vector.broadcast %cst : f32 to vector<2x8x8xf32>
    %33 = vector.broadcast %cst_24 : f32 to vector<2x8x8xf32>
    %34 = arith.select %31, %32, %33 : vector<2x8x8xi1>, vector<2x8x8xf32>
    %35 = vector.shape_cast %34 : vector<2x8x8xf32> to vector<2x1x8x8xf32>
    %c0_25 = arith.constant 0 : index
    %c0_26 = arith.constant 0 : index
    %c0_27 = arith.constant 0 : index
    %36 = vector.load %arg3[%c0_25, %c0_26, %c0_27] : memref<2x1x16xi32, #tpu.memory_space<vmem>>, vector<2x1x16xi32>
    %c0_i32_28 = arith.constant 0 : i32
    %37 = vector.broadcast %c0_i32_28 : i32 to vector<2x1x16xi32>
    %38 = arith.cmpi eq, %36, %37 : vector<2x1x16xi32>
    %cst_29 = arith.constant -1.000000e+09 : f32
    %cst_30 = arith.constant 0.000000e+00 : f32
    %39 = vector.broadcast %cst_29 : f32 to vector<2x1x16xf32>
    %40 = vector.broadcast %cst_30 : f32 to vector<2x1x16xf32>
    %41 = arith.select %38, %39, %40 : vector<2x1x16xi1>, vector<2x1x16xf32>
    %42 = vector.shape_cast %41 : vector<2x1x16xf32> to vector<2x1x1x16xf32>
    %c0_31 = arith.constant 0 : index
    %c0_32 = arith.constant 0 : index
    %43 = vector.load %arg0[%c0_31, %c0_32] : memref<16x32xf32, #tpu.memory_space<vmem>>, vector<16x32xf32>
    %c0_33 = arith.constant 0 : index
    %c0_34 = arith.constant 0 : index
    %44 = vector.load %arg1[%c0_33, %c0_34] : memref<32x32xf32, #tpu.memory_space<vmem>>, vector<32x32xf32>
    %cst_35 = arith.constant dense<0.000000e+00> : vector<16xf32>
    %45 = vector.multi_reduction <add>, %43, %cst_35 [1] : vector<16x32xf32> to vector<16xf32>
    %46 = vector.shape_cast %45 : vector<16xf32> to vector<16x1xf32>
    %cst_36 = arith.constant 3.200000e+01 : f32
    %47 = vector.broadcast %cst_36 : f32 to vector<16x1xf32>
    %48 = arith.divf %46, %47 : vector<16x1xf32>
    %49 = vector.broadcast %48 : vector<16x1xf32> to vector<16x32xf32>
    %50 = arith.subf %43, %49 : vector<16x32xf32>
    %51 = arith.mulf %50, %50 : vector<16x32xf32>
    %cst_37 = arith.constant dense<0.000000e+00> : vector<16xf32>
    %52 = vector.multi_reduction <add>, %51, %cst_37 [1] : vector<16x32xf32> to vector<16xf32>
    %53 = vector.shape_cast %52 : vector<16xf32> to vector<16x1xf32>
    %cst_38 = arith.constant 0.0322580636 : f32
    %54 = vector.broadcast %cst_38 : f32 to vector<16x1xf32>
    %55 = arith.mulf %53, %54 : vector<16x1xf32>
    %56 = math.sqrt %55 : vector<16x1xf32>
    %cst_39 = arith.constant 9.99999997E-7 : f32
    %57 = vector.broadcast %cst_39 : f32 to vector<16x1xf32>
    %58 = arith.addf %56, %57 : vector<16x1xf32>
    %59 = tpu.reciprocal %58 {approx = true} : vector<16x1xf32> -> vector<16x1xf32>
    %60 = vector.broadcast %59 : vector<16x1xf32> to vector<16x32xf32>
    %61 = arith.mulf %50, %60 : vector<16x32xf32>
    %62 = vector.broadcast %16 : vector<1x32xf32> to vector<16x32xf32>
    %63 = arith.mulf %62, %61 : vector<16x32xf32>
    %64 = vector.broadcast %17 : vector<1x32xf32> to vector<16x32xf32>
    %65 = arith.addf %63, %64 : vector<16x32xf32>
    %66 = arith.truncf %65 : vector<16x32xf32> to vector<16x32xbf16>
    %cst_40 = arith.constant dense<0.000000e+00> : vector<16x96xf32>
    %67 = tpu.matmul %66, %1, %cst_40 {dimension_numbers = #tpu.dot_dimension_numbers<[1], [0], [0], [1], [0, 0, 1, 1], [], []>} : vector<16x32xbf16>, vector<32x96xbf16>, vector<16x96xf32> -> vector<16x96xf32>
    %68 = vector.broadcast %18 : vector<1x96xf32> to vector<16x96xf32>
    %69 = arith.addf %67, %68 : vector<16x96xf32>
    %70 = vector.extract_strided_slice %69 {offsets = [0, 0], sizes = [16, 32], strides = [1, 1]} : vector<16x96xf32> to vector<16x32xf32>
    %71 = vector.extract_strided_slice %69 {offsets = [0, 32], sizes = [16, 32], strides = [1, 1]} : vector<16x96xf32> to vector<16x32xf32>
    %72 = vector.extract_strided_slice %69 {offsets = [0, 64], sizes = [16, 32], strides = [1, 1]} : vector<16x96xf32> to vector<16x32xf32>
    %73 = vector.shape_cast %70 : vector<16x32xf32> to vector<2x8x32xf32>
    %74 = arith.truncf %73 : vector<2x8x32xf32> to vector<2x8x32xbf16>
    %75 = vector.shape_cast %71 : vector<16x32xf32> to vector<2x8x32xf32>
    %76 = arith.truncf %75 : vector<2x8x32xf32> to vector<2x8x32xbf16>
    %77 = vector.shape_cast %72 : vector<16x32xf32> to vector<2x8x32xf32>
    %78 = arith.truncf %77 : vector<2x8x32xf32> to vector<2x8x32xbf16>
    %79 = vector.extract_strided_slice %74 {offsets = [0, 0, 0], sizes = [2, 8, 8], strides = [1, 1, 1]} : vector<2x8x32xbf16> to vector<2x8x8xbf16>
    %80 = vector.extract_strided_slice %76 {offsets = [0, 0, 0], sizes = [2, 8, 8], strides = [1, 1, 1]} : vector<2x8x32xbf16> to vector<2x8x8xbf16>
    "tpu.trace_start"() <{level = 10 : i32, message = "bqd,bkd->bqk"}> : () -> ()
    %cst_41 = arith.constant dense<0.000000e+00> : vector<2x8x8xf32>
    %81 = tpu.matmul %79, %80, %cst_41 {dimension_numbers = #tpu.dot_dimension_numbers<[2], [2], [1], [1], [0, 0, 0, 1, 1, 1], [0], [0]>} : vector<2x8x8xbf16>, vector<2x8x8xbf16>, vector<2x8x8xf32> -> vector<2x8x8xf32>
    "tpu.trace_stop"() : () -> ()
    %82 = vector.extract_strided_slice %74 {offsets = [0, 0, 8], sizes = [2, 8, 8], strides = [1, 1, 1]} : vector<2x8x32xbf16> to vector<2x8x8xbf16>
    %83 = vector.extract_strided_slice %76 {offsets = [0, 0, 8], sizes = [2, 8, 8], strides = [1, 1, 1]} : vector<2x8x32xbf16> to vector<2x8x8xbf16>
    "tpu.trace_start"() <{level = 10 : i32, message = "bqd,bkd->bqk"}> : () -> ()
    %cst_42 = arith.constant dense<0.000000e+00> : vector<2x8x8xf32>
    %84 = tpu.matmul %82, %83, %cst_42 {dimension_numbers = #tpu.dot_dimension_numbers<[2], [2], [1], [1], [0, 0, 0, 1, 1, 1], [0], [0]>} : vector<2x8x8xbf16>, vector<2x8x8xbf16>, vector<2x8x8xf32> -> vector<2x8x8xf32>
    "tpu.trace_stop"() : () -> ()
    %85 = vector.extract_strided_slice %74 {offsets = [0, 0, 16], sizes = [2, 8, 8], strides = [1, 1, 1]} : vector<2x8x32xbf16> to vector<2x8x8xbf16>
    %86 = vector.extract_strided_slice %76 {offsets = [0, 0, 16], sizes = [2, 8, 8], strides = [1, 1, 1]} : vector<2x8x32xbf16> to vector<2x8x8xbf16>
    "tpu.trace_start"() <{level = 10 : i32, message = "bqd,bkd->bqk"}> : () -> ()
    %cst_43 = arith.constant dense<0.000000e+00> : vector<2x8x8xf32>
    %87 = tpu.matmul %85, %86, %cst_43 {dimension_numbers = #tpu.dot_dimension_numbers<[2], [2], [1], [1], [0, 0, 0, 1, 1, 1], [0], [0]>} : vector<2x8x8xbf16>, vector<2x8x8xbf16>, vector<2x8x8xf32> -> vector<2x8x8xf32>
    "tpu.trace_stop"() : () -> ()
    %88 = vector.extract_strided_slice %74 {offsets = [0, 0, 24], sizes = [2, 8, 8], strides = [1, 1, 1]} : vector<2x8x32xbf16> to vector<2x8x8xbf16>
    %89 = vector.extract_strided_slice %76 {offsets = [0, 0, 24], sizes = [2, 8, 8], strides = [1, 1, 1]} : vector<2x8x32xbf16> to vector<2x8x8xbf16>
    "tpu.trace_start"() <{level = 10 : i32, message = "bqd,bkd->bqk"}> : () -> ()
    %cst_44 = arith.constant dense<0.000000e+00> : vector<2x8x8xf32>
    %90 = tpu.matmul %88, %89, %cst_44 {dimension_numbers = #tpu.dot_dimension_numbers<[2], [2], [1], [1], [0, 0, 0, 1, 1, 1], [0], [0]>} : vector<2x8x8xbf16>, vector<2x8x8xbf16>, vector<2x8x8xf32> -> vector<2x8x8xf32>
    "tpu.trace_stop"() : () -> ()
    %91 = vector.shape_cast %81 : vector<2x8x8xf32> to vector<2x1x8x8xf32>
    %92 = vector.shape_cast %84 : vector<2x8x8xf32> to vector<2x1x8x8xf32>
    %93 = vector.shape_cast %87 : vector<2x8x8xf32> to vector<2x1x8x8xf32>
    %94 = vector.shape_cast %90 : vector<2x8x8xf32> to vector<2x1x8x8xf32>
    %95 = tpu.concatenate %91, %92, %93, %94 in 1 : vector<2x1x8x8xf32>, vector<2x1x8x8xf32>, vector<2x1x8x8xf32>, vector<2x1x8x8xf32> -> vector<2x4x8x8xf32>
    %96 = vector.broadcast %35 : vector<2x1x8x8xf32> to vector<2x4x8x8xf32>
    %97 = arith.addf %95, %96 : vector<2x4x8x8xf32>
    %cst_45 = arith.constant dense<0xFF800000> : vector<2x4x8xf32>
    %98 = vector.multi_reduction <maximumf>, %97, %cst_45 [3] : vector<2x4x8x8xf32> to vector<2x4x8xf32>
    %99 = vector.shape_cast %98 : vector<2x4x8xf32> to vector<2x4x8x1xf32>
    %100 = vector.broadcast %99 : vector<2x4x8x1xf32> to vector<2x4x8x8xf32>
    %101 = arith.subf %97, %100 : vector<2x4x8x8xf32>
    %102 = math.exp %101 : vector<2x4x8x8xf32>
    %cst_46 = arith.constant dense<0.000000e+00> : vector<2x4x8xf32>
    %103 = vector.multi_reduction <add>, %102, %cst_46 [3] : vector<2x4x8x8xf32> to vector<2x4x8xf32>
    %104 = vector.shape_cast %103 : vector<2x4x8xf32> to vector<2x4x8x1xf32>
    %105 = tpu.reciprocal %104 {approx = true} : vector<2x4x8x1xf32> -> vector<2x4x8x1xf32>
    %106 = vector.broadcast %105 : vector<2x4x8x1xf32> to vector<2x4x8x8xf32>
    %107 = arith.mulf %102, %106 : vector<2x4x8x8xf32>
    %108 = arith.truncf %107 : vector<2x4x8x8xf32> to vector<2x4x8x8xbf16>
    %109 = vector.extract_strided_slice %108 {offsets = [0, 0, 0, 0], sizes = [2, 1, 8, 8], strides = [1, 1, 1, 1]} : vector<2x4x8x8xbf16> to vector<2x1x8x8xbf16>
    %110 = vector.shape_cast %109 : vector<2x1x8x8xbf16> to vector<2x8x8xbf16>
    %111 = vector.extract_strided_slice %78 {offsets = [0, 0, 0], sizes = [2, 8, 8], strides = [1, 1, 1]} : vector<2x8x32xbf16> to vector<2x8x8xbf16>
    "tpu.trace_start"() <{level = 10 : i32, message = "bqk,bkd->bqd"}> : () -> ()
    %cst_47 = arith.constant dense<0.000000e+00> : vector<2x8x8xf32>
    %112 = tpu.matmul %110, %111, %cst_47 {dimension_numbers = #tpu.dot_dimension_numbers<[2], [1], [1], [2], [0, 0, 0, 1, 1, 2], [0], [0]>} : vector<2x8x8xbf16>, vector<2x8x8xbf16>, vector<2x8x8xf32> -> vector<2x8x8xf32>
    "tpu.trace_stop"() : () -> ()
    %113 = vector.extract_strided_slice %108 {offsets = [0, 1, 0, 0], sizes = [2, 1, 8, 8], strides = [1, 1, 1, 1]} : vector<2x4x8x8xbf16> to vector<2x1x8x8xbf16>
    %114 = vector.shape_cast %113 : vector<2x1x8x8xbf16> to vector<2x8x8xbf16>
    %115 = vector.extract_strided_slice %78 {offsets = [0, 0, 8], sizes = [2, 8, 8], strides = [1, 1, 1]} : vector<2x8x32xbf16> to vector<2x8x8xbf16>
    "tpu.trace_start"() <{level = 10 : i32, message = "bqk,bkd->bqd"}> : () -> ()
    %cst_48 = arith.constant dense<0.000000e+00> : vector<2x8x8xf32>
    %116 = tpu.matmul %114, %115, %cst_48 {dimension_numbers = #tpu.dot_dimension_numbers<[2], [1], [1], [2], [0, 0, 0, 1, 1, 2], [0], [0]>} : vector<2x8x8xbf16>, vector<2x8x8xbf16>, vector<2x8x8xf32> -> vector<2x8x8xf32>
    "tpu.trace_stop"() : () -> ()
    %117 = vector.extract_strided_slice %108 {offsets = [0, 2, 0, 0], sizes = [2, 1, 8, 8], strides = [1, 1, 1, 1]} : vector<2x4x8x8xbf16> to vector<2x1x8x8xbf16>
    %118 = vector.shape_cast %117 : vector<2x1x8x8xbf16> to vector<2x8x8xbf16>
    %119 = vector.extract_strided_slice %78 {offsets = [0, 0, 16], sizes = [2, 8, 8], strides = [1, 1, 1]} : vector<2x8x32xbf16> to vector<2x8x8xbf16>
    "tpu.trace_start"() <{level = 10 : i32, message = "bqk,bkd->bqd"}> : () -> ()
    %cst_49 = arith.constant dense<0.000000e+00> : vector<2x8x8xf32>
    %120 = tpu.matmul %118, %119, %cst_49 {dimension_numbers = #tpu.dot_dimension_numbers<[2], [1], [1], [2], [0, 0, 0, 1, 1, 2], [0], [0]>} : vector<2x8x8xbf16>, vector<2x8x8xbf16>, vector<2x8x8xf32> -> vector<2x8x8xf32>
    "tpu.trace_stop"() : () -> ()
    %121 = vector.extract_strided_slice %108 {offsets = [0, 3, 0, 0], sizes = [2, 1, 8, 8], strides = [1, 1, 1, 1]} : vector<2x4x8x8xbf16> to vector<2x1x8x8xbf16>
    %122 = vector.shape_cast %121 : vector<2x1x8x8xbf16> to vector<2x8x8xbf16>
    %123 = vector.extract_strided_slice %78 {offsets = [0, 0, 24], sizes = [2, 8, 8], strides = [1, 1, 1]} : vector<2x8x32xbf16> to vector<2x8x8xbf16>
    "tpu.trace_start"() <{level = 10 : i32, message = "bqk,bkd->bqd"}> : () -> ()
    %cst_50 = arith.constant dense<0.000000e+00> : vector<2x8x8xf32>
    %124 = tpu.matmul %122, %123, %cst_50 {dimension_numbers = #tpu.dot_dimension_numbers<[2], [1], [1], [2], [0, 0, 0, 1, 1, 2], [0], [0]>} : vector<2x8x8xbf16>, vector<2x8x8xbf16>, vector<2x8x8xf32> -> vector<2x8x8xf32>
    "tpu.trace_stop"() : () -> ()
    %125 = vector.shape_cast %112 : vector<2x8x8xf32> to vector<1x2x8x8xf32>
    %126 = vector.shape_cast %116 : vector<2x8x8xf32> to vector<1x2x8x8xf32>
    %127 = vector.shape_cast %120 : vector<2x8x8xf32> to vector<1x2x8x8xf32>
    %128 = vector.shape_cast %124 : vector<2x8x8xf32> to vector<1x2x8x8xf32>
    %129 = tpu.concatenate %125, %126, %127, %128 in 0 : vector<1x2x8x8xf32>, vector<1x2x8x8xf32>, vector<1x2x8x8xf32>, vector<1x2x8x8xf32> -> vector<4x2x8x8xf32>
    %130 = vector.shape_cast %129 : vector<4x2x8x8xf32> to vector<4x16x8xf32>
    %131 = arith.truncf %130 : vector<4x16x8xf32> to vector<4x16x8xbf16>
    "tpu.trace_start"() <{level = 10 : i32, message = "hnd,hde->hne"}> : () -> ()
    %cst_51 = arith.constant dense<0.000000e+00> : vector<4x16x32xf32>
    %132 = tpu.matmul %131, %4, %cst_51 {dimension_numbers = #tpu.dot_dimension_numbers<[2], [1], [1], [2], [0, 0, 0, 1, 1, 2], [0], [0]>} : vector<4x16x8xbf16>, vector<4x8x32xbf16>, vector<4x16x32xf32> -> vector<4x16x32xf32>
    "tpu.trace_stop"() : () -> ()
    %cst_52 = arith.constant dense<0.000000e+00> : vector<16x32xf32>
    %133 = vector.multi_reduction <add>, %132, %cst_52 [0] : vector<4x16x32xf32> to vector<16x32xf32>
    %134 = vector.broadcast %19 : vector<1x32xf32> to vector<16x32xf32>
    %135 = arith.addf %133, %134 : vector<16x32xf32>
    %136 = arith.addf %43, %135 : vector<16x32xf32>
    %cst_53 = arith.constant dense<0.000000e+00> : vector<16xf32>
    %137 = vector.multi_reduction <add>, %136, %cst_53 [1] : vector<16x32xf32> to vector<16xf32>
    %138 = vector.shape_cast %137 : vector<16xf32> to vector<16x1xf32>
    %cst_54 = arith.constant 3.200000e+01 : f32
    %139 = vector.broadcast %cst_54 : f32 to vector<16x1xf32>
    %140 = arith.divf %138, %139 : vector<16x1xf32>
    %141 = vector.broadcast %140 : vector<16x1xf32> to vector<16x32xf32>
    %142 = arith.subf %136, %141 : vector<16x32xf32>
    %143 = arith.mulf %142, %142 : vector<16x32xf32>
    %cst_55 = arith.constant dense<0.000000e+00> : vector<16xf32>
    %144 = vector.multi_reduction <add>, %143, %cst_55 [1] : vector<16x32xf32> to vector<16xf32>
    %145 = vector.shape_cast %144 : vector<16xf32> to vector<16x1xf32>
    %cst_56 = arith.constant 0.0322580636 : f32
    %146 = vector.broadcast %cst_56 : f32 to vector<16x1xf32>
    %147 = arith.mulf %145, %146 : vector<16x1xf32>
    %148 = math.sqrt %147 : vector<16x1xf32>
    %cst_57 = arith.constant 9.99999997E-7 : f32
    %149 = vector.broadcast %cst_57 : f32 to vector<16x1xf32>
    %150 = arith.addf %148, %149 : vector<16x1xf32>
    %151 = tpu.reciprocal %150 {approx = true} : vector<16x1xf32> -> vector<16x1xf32>
    %152 = vector.broadcast %151 : vector<16x1xf32> to vector<16x32xf32>
    %153 = arith.mulf %142, %152 : vector<16x32xf32>
    %154 = vector.broadcast %20 : vector<1x32xf32> to vector<16x32xf32>
    %155 = arith.mulf %154, %153 : vector<16x32xf32>
    %156 = vector.broadcast %21 : vector<1x32xf32> to vector<16x32xf32>
    %157 = arith.addf %155, %156 : vector<16x32xf32>
    %158 = arith.truncf %157 : vector<16x32xf32> to vector<16x32xbf16>
    %cst_58 = arith.constant dense<0.000000e+00> : vector<16x32xf32>
    %159 = tpu.matmul %158, %6, %cst_58 {dimension_numbers = #tpu.dot_dimension_numbers<[1], [0], [0], [1], [0, 0, 1, 1], [], []>} : vector<16x32xbf16>, vector<32x32xbf16>, vector<16x32xf32> -> vector<16x32xf32>
    %160 = vector.broadcast %22 : vector<1x32xf32> to vector<16x32xf32>
    %161 = arith.addf %159, %160 : vector<16x32xf32>
    %162 = arith.truncf %44 : vector<32x32xf32> to vector<32x32xbf16>
    %cst_59 = arith.constant dense<0.000000e+00> : vector<32x64xf32>
    %163 = tpu.matmul %162, %8, %cst_59 {dimension_numbers = #tpu.dot_dimension_numbers<[1], [0], [0], [1], [0, 0, 1, 1], [], []>} : vector<32x32xbf16>, vector<32x64xbf16>, vector<32x64xf32> -> vector<32x64xf32>
    %164 = vector.broadcast %23 : vector<1x64xf32> to vector<32x64xf32>
    %165 = arith.addf %163, %164 : vector<32x64xf32>
    %166 = vector.extract_strided_slice %165 {offsets = [0, 0], sizes = [32, 32], strides = [1, 1]} : vector<32x64xf32> to vector<32x32xf32>
    %167 = vector.extract_strided_slice %165 {offsets = [0, 32], sizes = [32, 32], strides = [1, 1]} : vector<32x64xf32> to vector<32x32xf32>
    %168 = vector.shape_cast %161 : vector<16x32xf32> to vector<2x8x32xf32>
    %169 = arith.truncf %168 : vector<2x8x32xf32> to vector<2x8x32xbf16>
    %170 = vector.shape_cast %166 : vector<32x32xf32> to vector<2x16x32xf32>
    %171 = arith.truncf %170 : vector<2x16x32xf32> to vector<2x16x32xbf16>
    %172 = vector.shape_cast %167 : vector<32x32xf32> to vector<2x16x32xf32>
    %173 = arith.truncf %172 : vector<2x16x32xf32> to vector<2x16x32xbf16>
    %174 = vector.extract_strided_slice %169 {offsets = [0, 0, 0], sizes = [2, 8, 8], strides = [1, 1, 1]} : vector<2x8x32xbf16> to vector<2x8x8xbf16>
    %175 = vector.extract_strided_slice %171 {offsets = [0, 0, 0], sizes = [2, 16, 8], strides = [1, 1, 1]} : vector<2x16x32xbf16> to vector<2x16x8xbf16>
    "tpu.trace_start"() <{level = 10 : i32, message = "bqd,bkd->bqk"}> : () -> ()
    %cst_60 = arith.constant dense<0.000000e+00> : vector<2x8x16xf32>
    %176 = tpu.matmul %174, %175, %cst_60 {dimension_numbers = #tpu.dot_dimension_numbers<[2], [2], [1], [1], [0, 0, 0, 1, 1, 1], [0], [0]>} : vector<2x8x8xbf16>, vector<2x16x8xbf16>, vector<2x8x16xf32> -> vector<2x8x16xf32>
    "tpu.trace_stop"() : () -> ()
    %177 = vector.extract_strided_slice %169 {offsets = [0, 0, 8], sizes = [2, 8, 8], strides = [1, 1, 1]} : vector<2x8x32xbf16> to vector<2x8x8xbf16>
    %178 = vector.extract_strided_slice %171 {offsets = [0, 0, 8], sizes = [2, 16, 8], strides = [1, 1, 1]} : vector<2x16x32xbf16> to vector<2x16x8xbf16>
    "tpu.trace_start"() <{level = 10 : i32, message = "bqd,bkd->bqk"}> : () -> ()
    %cst_61 = arith.constant dense<0.000000e+00> : vector<2x8x16xf32>
    %179 = tpu.matmul %177, %178, %cst_61 {dimension_numbers = #tpu.dot_dimension_numbers<[2], [2], [1], [1], [0, 0, 0, 1, 1, 1], [0], [0]>} : vector<2x8x8xbf16>, vector<2x16x8xbf16>, vector<2x8x16xf32> -> vector<2x8x16xf32>
    "tpu.trace_stop"() : () -> ()
    %180 = vector.extract_strided_slice %169 {offsets = [0, 0, 16], sizes = [2, 8, 8], strides = [1, 1, 1]} : vector<2x8x32xbf16> to vector<2x8x8xbf16>
    %181 = vector.extract_strided_slice %171 {offsets = [0, 0, 16], sizes = [2, 16, 8], strides = [1, 1, 1]} : vector<2x16x32xbf16> to vector<2x16x8xbf16>
    "tpu.trace_start"() <{level = 10 : i32, message = "bqd,bkd->bqk"}> : () -> ()
    %cst_62 = arith.constant dense<0.000000e+00> : vector<2x8x16xf32>
    %182 = tpu.matmul %180, %181, %cst_62 {dimension_numbers = #tpu.dot_dimension_numbers<[2], [2], [1], [1], [0, 0, 0, 1, 1, 1], [0], [0]>} : vector<2x8x8xbf16>, vector<2x16x8xbf16>, vector<2x8x16xf32> -> vector<2x8x16xf32>
    "tpu.trace_stop"() : () -> ()
    %183 = vector.extract_strided_slice %169 {offsets = [0, 0, 24], sizes = [2, 8, 8], strides = [1, 1, 1]} : vector<2x8x32xbf16> to vector<2x8x8xbf16>
    %184 = vector.extract_strided_slice %171 {offsets = [0, 0, 24], sizes = [2, 16, 8], strides = [1, 1, 1]} : vector<2x16x32xbf16> to vector<2x16x8xbf16>
    "tpu.trace_start"() <{level = 10 : i32, message = "bqd,bkd->bqk"}> : () -> ()
    %cst_63 = arith.constant dense<0.000000e+00> : vector<2x8x16xf32>
    %185 = tpu.matmul %183, %184, %cst_63 {dimension_numbers = #tpu.dot_dimension_numbers<[2], [2], [1], [1], [0, 0, 0, 1, 1, 1], [0], [0]>} : vector<2x8x8xbf16>, vector<2x16x8xbf16>, vector<2x8x16xf32> -> vector<2x8x16xf32>
    "tpu.trace_stop"() : () -> ()
    %186 = vector.shape_cast %176 : vector<2x8x16xf32> to vector<2x1x8x16xf32>
    %187 = vector.shape_cast %179 : vector<2x8x16xf32> to vector<2x1x8x16xf32>
    %188 = vector.shape_cast %182 : vector<2x8x16xf32> to vector<2x1x8x16xf32>
    %189 = vector.shape_cast %185 : vector<2x8x16xf32> to vector<2x1x8x16xf32>
    %190 = tpu.concatenate %186, %187, %188, %189 in 1 : vector<2x1x8x16xf32>, vector<2x1x8x16xf32>, vector<2x1x8x16xf32>, vector<2x1x8x16xf32> -> vector<2x4x8x16xf32>
    %191 = vector.broadcast %42 : vector<2x1x1x16xf32> to vector<2x4x8x16xf32>
    %192 = arith.addf %190, %191 : vector<2x4x8x16xf32>
    %cst_64 = arith.constant dense<0xFF800000> : vector<2x4x8xf32>
    %193 = vector.multi_reduction <maximumf>, %192, %cst_64 [3] : vector<2x4x8x16xf32> to vector<2x4x8xf32>
    %194 = vector.shape_cast %193 : vector<2x4x8xf32> to vector<2x4x8x1xf32>
    %195 = vector.broadcast %194 : vector<2x4x8x1xf32> to vector<2x4x8x16xf32>
    %196 = arith.subf %192, %195 : vector<2x4x8x16xf32>
    %197 = math.exp %196 : vector<2x4x8x16xf32>
    %cst_65 = arith.constant dense<0.000000e+00> : vector<2x4x8xf32>
    %198 = vector.multi_reduction <add>, %197, %cst_65 [3] : vector<2x4x8x16xf32> to vector<2x4x8xf32>
    %199 = vector.shape_cast %198 : vector<2x4x8xf32> to vector<2x4x8x1xf32>
    %200 = tpu.reciprocal %199 {approx = true} : vector<2x4x8x1xf32> -> vector<2x4x8x1xf32>
    %201 = vector.broadcast %200 : vector<2x4x8x1xf32> to vector<2x4x8x16xf32>
    %202 = arith.mulf %197, %201 : vector<2x4x8x16xf32>
    %203 = arith.truncf %202 : vector<2x4x8x16xf32> to vector<2x4x8x16xbf16>
    %204 = vector.extract_strided_slice %203 {offsets = [0, 0, 0, 0], sizes = [2, 1, 8, 16], strides = [1, 1, 1, 1]} : vector<2x4x8x16xbf16> to vector<2x1x8x16xbf16>
    %205 = vector.shape_cast %204 : vector<2x1x8x16xbf16> to vector<2x8x16xbf16>
    %206 = vector.extract_strided_slice %173 {offsets = [0, 0, 0], sizes = [2, 16, 8], strides = [1, 1, 1]} : vector<2x16x32xbf16> to vector<2x16x8xbf16>
    "tpu.trace_start"() <{level = 10 : i32, message = "bqk,bkd->bqd"}> : () -> ()
    %cst_66 = arith.constant dense<0.000000e+00> : vector<2x8x8xf32>
    %207 = tpu.matmul %205, %206, %cst_66 {dimension_numbers = #tpu.dot_dimension_numbers<[2], [1], [1], [2], [0, 0, 0, 1, 1, 2], [0], [0]>} : vector<2x8x16xbf16>, vector<2x16x8xbf16>, vector<2x8x8xf32> -> vector<2x8x8xf32>
    "tpu.trace_stop"() : () -> ()
    %208 = vector.extract_strided_slice %203 {offsets = [0, 1, 0, 0], sizes = [2, 1, 8, 16], strides = [1, 1, 1, 1]} : vector<2x4x8x16xbf16> to vector<2x1x8x16xbf16>
    %209 = vector.shape_cast %208 : vector<2x1x8x16xbf16> to vector<2x8x16xbf16>
    %210 = vector.extract_strided_slice %173 {offsets = [0, 0, 8], sizes = [2, 16, 8], strides = [1, 1, 1]} : vector<2x16x32xbf16> to vector<2x16x8xbf16>
    "tpu.trace_start"() <{level = 10 : i32, message = "bqk,bkd->bqd"}> : () -> ()
    %cst_67 = arith.constant dense<0.000000e+00> : vector<2x8x8xf32>
    %211 = tpu.matmul %209, %210, %cst_67 {dimension_numbers = #tpu.dot_dimension_numbers<[2], [1], [1], [2], [0, 0, 0, 1, 1, 2], [0], [0]>} : vector<2x8x16xbf16>, vector<2x16x8xbf16>, vector<2x8x8xf32> -> vector<2x8x8xf32>
    "tpu.trace_stop"() : () -> ()
    %212 = vector.extract_strided_slice %203 {offsets = [0, 2, 0, 0], sizes = [2, 1, 8, 16], strides = [1, 1, 1, 1]} : vector<2x4x8x16xbf16> to vector<2x1x8x16xbf16>
    %213 = vector.shape_cast %212 : vector<2x1x8x16xbf16> to vector<2x8x16xbf16>
    %214 = vector.extract_strided_slice %173 {offsets = [0, 0, 16], sizes = [2, 16, 8], strides = [1, 1, 1]} : vector<2x16x32xbf16> to vector<2x16x8xbf16>
    "tpu.trace_start"() <{level = 10 : i32, message = "bqk,bkd->bqd"}> : () -> ()
    %cst_68 = arith.constant dense<0.000000e+00> : vector<2x8x8xf32>
    %215 = tpu.matmul %213, %214, %cst_68 {dimension_numbers = #tpu.dot_dimension_numbers<[2], [1], [1], [2], [0, 0, 0, 1, 1, 2], [0], [0]>} : vector<2x8x16xbf16>, vector<2x16x8xbf16>, vector<2x8x8xf32> -> vector<2x8x8xf32>
    "tpu.trace_stop"() : () -> ()
    %216 = vector.extract_strided_slice %203 {offsets = [0, 3, 0, 0], sizes = [2, 1, 8, 16], strides = [1, 1, 1, 1]} : vector<2x4x8x16xbf16> to vector<2x1x8x16xbf16>
    %217 = vector.shape_cast %216 : vector<2x1x8x16xbf16> to vector<2x8x16xbf16>
    %218 = vector.extract_strided_slice %173 {offsets = [0, 0, 24], sizes = [2, 16, 8], strides = [1, 1, 1]} : vector<2x16x32xbf16> to vector<2x16x8xbf16>
    "tpu.trace_start"() <{level = 10 : i32, message = "bqk,bkd->bqd"}> : () -> ()
    %cst_69 = arith.constant dense<0.000000e+00> : vector<2x8x8xf32>
    %219 = tpu.matmul %217, %218, %cst_69 {dimension_numbers = #tpu.dot_dimension_numbers<[2], [1], [1], [2], [0, 0, 0, 1, 1, 2], [0], [0]>} : vector<2x8x16xbf16>, vector<2x16x8xbf16>, vector<2x8x8xf32> -> vector<2x8x8xf32>
    "tpu.trace_stop"() : () -> ()
    %220 = vector.shape_cast %207 : vector<2x8x8xf32> to vector<1x2x8x8xf32>
    %221 = vector.shape_cast %211 : vector<2x8x8xf32> to vector<1x2x8x8xf32>
    %222 = vector.shape_cast %215 : vector<2x8x8xf32> to vector<1x2x8x8xf32>
    %223 = vector.shape_cast %219 : vector<2x8x8xf32> to vector<1x2x8x8xf32>
    %224 = tpu.concatenate %220, %221, %222, %223 in 0 : vector<1x2x8x8xf32>, vector<1x2x8x8xf32>, vector<1x2x8x8xf32>, vector<1x2x8x8xf32> -> vector<4x2x8x8xf32>
    %225 = vector.shape_cast %224 : vector<4x2x8x8xf32> to vector<4x16x8xf32>
    %226 = arith.truncf %225 : vector<4x16x8xf32> to vector<4x16x8xbf16>
    "tpu.trace_start"() <{level = 10 : i32, message = "hnd,hde->hne"}> : () -> ()
    %cst_70 = arith.constant dense<0.000000e+00> : vector<4x16x32xf32>
    %227 = tpu.matmul %226, %11, %cst_70 {dimension_numbers = #tpu.dot_dimension_numbers<[2], [1], [1], [2], [0, 0, 0, 1, 1, 2], [0], [0]>} : vector<4x16x8xbf16>, vector<4x8x32xbf16>, vector<4x16x32xf32> -> vector<4x16x32xf32>
    "tpu.trace_stop"() : () -> ()
    %cst_71 = arith.constant dense<0.000000e+00> : vector<16x32xf32>
    %228 = vector.multi_reduction <add>, %227, %cst_71 [0] : vector<4x16x32xf32> to vector<16x32xf32>
    %229 = vector.broadcast %24 : vector<1x32xf32> to vector<16x32xf32>
    %230 = arith.addf %228, %229 : vector<16x32xf32>
    %231 = arith.addf %136, %230 : vector<16x32xf32>
    %cst_72 = arith.constant dense<0.000000e+00> : vector<16xf32>
    %232 = vector.multi_reduction <add>, %231, %cst_72 [1] : vector<16x32xf32> to vector<16xf32>
    %233 = vector.shape_cast %232 : vector<16xf32> to vector<16x1xf32>
    %cst_73 = arith.constant 3.200000e+01 : f32
    %234 = vector.broadcast %cst_73 : f32 to vector<16x1xf32>
    %235 = arith.divf %233, %234 : vector<16x1xf32>
    %236 = vector.broadcast %235 : vector<16x1xf32> to vector<16x32xf32>
    %237 = arith.subf %231, %236 : vector<16x32xf32>
    %238 = arith.mulf %237, %237 : vector<16x32xf32>
    %cst_74 = arith.constant dense<0.000000e+00> : vector<16xf32>
    %239 = vector.multi_reduction <add>, %238, %cst_74 [1] : vector<16x32xf32> to vector<16xf32>
    %240 = vector.shape_cast %239 : vector<16xf32> to vector<16x1xf32>
    %cst_75 = arith.constant 0.0322580636 : f32
    %241 = vector.broadcast %cst_75 : f32 to vector<16x1xf32>
    %242 = arith.mulf %240, %241 : vector<16x1xf32>
    %243 = math.sqrt %242 : vector<16x1xf32>
    %cst_76 = arith.constant 9.99999997E-7 : f32
    %244 = vector.broadcast %cst_76 : f32 to vector<16x1xf32>
    %245 = arith.addf %243, %244 : vector<16x1xf32>
    %246 = tpu.reciprocal %245 {approx = true} : vector<16x1xf32> -> vector<16x1xf32>
    %247 = vector.broadcast %246 : vector<16x1xf32> to vector<16x32xf32>
    %248 = arith.mulf %237, %247 : vector<16x32xf32>
    %249 = vector.broadcast %25 : vector<1x32xf32> to vector<16x32xf32>
    %250 = arith.mulf %249, %248 : vector<16x32xf32>
    %251 = vector.broadcast %26 : vector<1x32xf32> to vector<16x32xf32>
    %252 = arith.addf %250, %251 : vector<16x32xf32>
    %253 = arith.truncf %252 : vector<16x32xf32> to vector<16x32xbf16>
    %cst_77 = arith.constant dense<0.000000e+00> : vector<16x64xf32>
    %254 = tpu.matmul %253, %13, %cst_77 {dimension_numbers = #tpu.dot_dimension_numbers<[1], [0], [0], [1], [0, 0, 1, 1], [], []>} : vector<16x32xbf16>, vector<32x64xbf16>, vector<16x64xf32> -> vector<16x64xf32>
    %255 = vector.broadcast %27 : vector<1x64xf32> to vector<16x64xf32>
    %256 = arith.addf %254, %255 : vector<16x64xf32>
    %cst_78 = arith.constant 0.000000e+00 : f32
    %257 = vector.broadcast %cst_78 : f32 to vector<16x64xf32>
    %258 = arith.maximumf %256, %257 : vector<16x64xf32>
    %259 = arith.truncf %258 : vector<16x64xf32> to vector<16x64xbf16>
    %cst_79 = arith.constant dense<0.000000e+00> : vector<16x32xf32>
    %260 = tpu.matmul %259, %15, %cst_79 {dimension_numbers = #tpu.dot_dimension_numbers<[1], [0], [0], [1], [0, 0, 1, 1], [], []>} : vector<16x64xbf16>, vector<64x32xbf16>, vector<16x32xf32> -> vector<16x32xf32>
    %261 = arith.addf %231, %260 : vector<16x32xf32>
    %262 = vector.broadcast %28 : vector<1x32xf32> to vector<16x32xf32>
    %263 = arith.addf %261, %262 : vector<16x32xf32>
    %c0_80 = arith.constant 0 : index
    %c0_81 = arith.constant 0 : index
    %264 = vector.load %arg6[%c0_80, %c0_81] : memref<16x32xf32, #tpu.memory_space<vmem>>, vector<16x32xf32>
    tpu.vector_store %arg6[%c0_80, %c0_81], %263 {strides = array<i32>} : memref<16x32xf32, #tpu.memory_space<vmem>>, vector<16x32xf32>,
    return
  }
}

</mosaic_0001>

<bundles_post_ra>
// kernel: decoder_layer_forward.1
= control target key start
LH: loop header
LB: loop body
LE: loop exit
PB: predicated region body
PF: predicated region fallthrough
CT: control target
= control target key end

     0   :  { %11 = vsyncpa [#allocation3], 0  ;;  %s3973_s0 = inlined_call_operand.vmem [shape: f32[16,32], index: 0, kind: input, shape index: {}, may-alias: {0,6}]   ;;  %s3974_s1 = inlined_call_operand.hbm [shape: f32[32,32], index: 1, kind: input, shape index: {}]   ;;  %s3975_s2 = inlined_call_operand.vmem [shape: s32[2,8,8], index: 2, kind: input, shape index: {}]   ;;  %s3976_s3 = inlined_call_operand.vmem [shape: s32[2,1,16], index: 3, kind: input, shape index: {}]   ;;  %s3977_s4 = inlined_call_operand.hbm [shape: f32[256,128], index: 4, kind: input, shape index: {}]   ;;  %s3978_s5 = inlined_call_operand.hbm [shape: f32[16,128], index: 5, kind: input, shape index: {}]   ;;  %s3979_s6 = inlined_call_operand.vmem [shape: f32[16,32], index: 6, kind: output, shape index: {}, may-alias: {0,6}]  }
   0x1   :  { %12 = vsyncpa [#allocation5], 0  ;;  %s3392_s21 = smov [#allocation4]   ;;  %s3393_s23 = smov [#allocation2]  }
   0x2   :  { %s36_s22 = sshll.u32 %s3392_s21, 4  ;;  %s20_s24 = sshll.u32 %s3393_s23, 4  ;;  %s37_s22 = int_to_ptr.vmem [resolvable:$true] %s36_s22  ;;  %s21_s24 = int_to_ptr.vmem [resolvable:$true] %s20_s24 }
   0x3   :  { %s3336_s25 = scalar_lea.vmem %s37_s22, 4096  ;;  %p3341_p1 = scmp.lt.s32.totalorder %s37_s22, %s37_s22 }
   0x4   :  { %p3337_p0 = scmp.ne.s32.totalorder %s37_s22, %s3336_s25  ;;  %p3342_p2 = scmp.lt.s32.totalorder %s3336_s25, %s3336_s25 }
   0x6   :  { %p3343_p3 = por %p3342_p2, %p3341_p1 }
   0x8   :  { %p3344_p4 = pnand %p3343_p3, %p3337_p0 }
   0xa   :  { %3347 = shalt.err (!%p3344_p4)
}
   0xb   :  { %s3394_s26 = smov 128   ;;  %s3395_s27 = smov 8  }
   0xc   :  { %42 = dma.hbm_to_vmem [thread:$0]  %s3977_s4, 4096, %s37_s22, [#allocation5], %s3394_s26, %s3394_s26, %s3395_s27  }
   0xd   :  { %s3356_s30 = scalar_lea.vmem %s21_s24, 512  ;;  %p3361_p6 = scmp.lt.s32.totalorder %s21_s24, %s21_s24 }
   0xe   :  { %p3357_p5 = scmp.ne.s32.totalorder %s21_s24, %s3356_s30  ;;  %p3362_p7 = scmp.lt.s32.totalorder %s3356_s30, %s3356_s30 }
  0x10   :  { %p3363_p8 = por %p3362_p7, %p3361_p6 }
  0x12   :  { %p3364_p9 = pnand %p3363_p8, %p3357_p5 }
  0x14   :  { %3367 = shalt.err (!%p3364_p9)
}
  0x15   :  { %26 = dma.hbm_to_vmem [thread:$0]  %s3974_s1, 512, %s21_s24, [#allocation3], %s3394_s26, %s3394_s26, %s3395_s27  }
  0x16   :  { %s3396_s9 = smov [#allocation6]  }
  0x17   :  { %s48_s10 = sshll.u32 %s3396_s9, 4  ;;  %s49_s10 = int_to_ptr.vmem [resolvable:$true] %s48_s10 }
  0x18   :  { %s3376_s11 = scalar_lea.vmem %s49_s10, 256  ;;  %p3381_p11 = scmp.lt.s32.totalorder %s49_s10, %s49_s10 }
  0x19   :  { %p3377_p10 = scmp.ne.s32.totalorder %s49_s10, %s3376_s11  ;;  %p3382_p12 = scmp.lt.s32.totalorder %s3376_s11, %s3376_s11 }
  0x1b   :  { %p3383_p13 = por %p3382_p12, %p3381_p11 }
  0x1d   :  { %p3384_p0 = pnand %p3383_p13, %p3377_p10 }
  0x1f   :  { %3387 = shalt.err (!%p3384_p0)
}
  0x20   :  { %54 = dma.hbm_to_vmem [thread:$0]  %s3978_s5, 256, %s49_s10, [#allocation5], %s3394_s26, %s3394_s26, %s3395_s27  }
  0x21   :  { %3388 = dma.done.wait [#allocation3], 512  }
  0x22   :  { %3389 = vsyncadd [#allocation3], 4294966784 }
  0x23   :  { %3390 = dma.done.wait [#allocation5], 4352  }
  0x24   :  { %3391 = vsyncadd [#allocation5], 4294962944  ;;  %vm148_vm0 = vcmask 261120   ;;  %v3457_v0 = vld [vmem:[%s3973_s0] sm:$0xff]  ;;  %v3462_v1 = vld [vmem:[%s3973_s0 + $0x8] sm:$0xff]  ;;  %v3397_v17 = vmov 0.0  }
  0x25   :  { %v149_v2 = vsel %vm148_vm0, %v3457_v0, 0.0  ;;  %v152_v3 = vsel %vm148_vm0, %v3462_v1, 0.0  ;;  %v67_v14 = vld [vmem:[#allocation4 + $0x10] sm:$0xff]  ;;  %v68_v15 = vld [vmem:[#allocation4 + $0x18] sm:$0xff]  ;;  %v65_v16 = vld [vmem:[#allocation4] sm:$0xff]  ;;  %2938 = vmatprep.subr.bf16.mxu1 %v3397_v17  ;;  %vm3398_vm1 = vmmov 0   ;;  %2952 = vmatprep.subr.bf16.mxu0 %v3397_v17 }
  0x26   :  { %150 = vadd.xlane.f32.xlu0 %v149_v2  ;;  %v70_v18 = vpack.c.bf16 %v68_v15, %v67_v14  ;;  %v66_v19 = vld [vmem:[#allocation4 + $0x8] sm:$0xff]  ;;  %2942 = vmatprep.mubr.msk.bf16.mxu1 %vm3398_vm1, %v3397_v17  ;;  %v2781_v39 = vld [vmem:[#allocation6] ss:$0 sm:$0xff]  ;;  %v2782_v43 = vld [vmem:[#allocation6 + $0x1] ss:$0 sm:$0xff]  ;;  %s3399_s0 = smov 96  }
  0x27   :  { %2954 = vmatprep.mubr.msk.bf16.mxu0 %vm3398_vm1, %v3397_v17  ;;  %v69_v20 = vpack.c.bf16 %v66_v19, %v65_v16  ;;  %v2783_v48 = vld [vmem:[#allocation6 + $0x2] ss:$0 sm:$0xff]  ;;  %s3400_s5 = smov 120   ;;  %s3401_s16 = smov 80   ;;  %vm256_vm6 = vcmask 64512   ;;  %v131_v19 = vld [vmem:[%s3975_s2 + $0x8] sm:$0xff] }
  0x28   :  { %2939 = vmatpush3.bf16.msra.mxu1 %v70_v18  ;;  %s3402_s17 = smov 88   ;;  %s3403_s18 = smov 112   ;;  %v130_v18 = vld [vmem:[%s3975_s2] sm:$0xff]  ;;  %vm133_vm8 = vcmp.eq.s32.totalorder %v131_v19, 0  ;;  %vm761_vm9 = vcmask 1043456  }
  0x29   :  { %2940 = vmatprep.subr.bf16.mxu1 %v3397_v17  ;;  %s3404_s19 = smov 72   ;;  %s3405_s20 = smov 104   ;;  %vm132_vm7 = vcmp.eq.s32.totalorder %v130_v18, 0 }
  0x2a   :  { %153 = vadd.xlane.f32.xlu0 %v152_v3  ;;  %s3406_s2 = smov 64   ;;  %s3407_s25 = smov 56  }
  0x2b   :  { %s3408_s26 = smov 48   ;;  %s3409_s27 = smov 40  }
  0x2c   :  { %2941 = vmatpush3.bf16.msra.mxu1 %v69_v20  ;;  %v134_v20 = vsel %vm132_vm7, -1e+09, %v3397_v17 }
  0x2d   :  { %2946 = vmatprep.subr.bf16.mxu1 %v3397_v17 }
  0xaf   :  { %v151_v4 = vpop.xlane.xlu0 %150 }
  0xb0   :  { %v156_v5 = vmul.f32 0.03125, %v151_v4 }
  0xb2   :  { %v158_v6 = vsub.f32 %v3457_v0, %v156_v5 }
  0xb3   :  { %v154_v7 = vpop.xlane.xlu0 %153 }
  0xb4   :  { %v157_v8 = vmul.f32 0.03125, %v154_v7  ;;  %v160_v9 = vmul.f32 %v158_v6, %v158_v6 }
  0xb6   :  { %v159_v10 = vsub.f32 %v3462_v1, %v157_v8  ;;  %v162_v11 = vsel %vm148_vm0, %v160_v9, 0.0 }
  0xb7   :  { %163 = vadd.xlane.f32.xlu1 %v162_v11 }
  0xb8   :  { %v161_v12 = vmul.f32 %v159_v10, %v159_v10 }
  0xba   :  { %v165_v13 = vsel %vm148_vm0, %v161_v12, 0.0 }
  0xbb   :  { %166 = vadd.xlane.f32.xlu1 %v165_v13 }
 0x140   :  { %v164_v21 = vpop.xlane.xlu1 %163 }
 0x141   :  { %v168_v22 = vmul.f32 0.032258064, %v164_v21 }
 0x143   :  { %3240 = vrsqrt.f32 %v168_v22  ;;  %vm172_vm2 = vcmp.eq.f32.partialorder %v168_v22, inf  ;;  %v175_v27 = vand.u32 2147483648, %v168_v22  ;;  %vm174_vm3 = vcmp.eq.f32.partialorder %v168_v22, 0.0 }
 0x144   :  { %v167_v23 = vpop.xlane.xlu1 %166 }
 0x145   :  { %v169_v24 = vmul.f32 0.032258064, %v167_v23 }
 0x147   :  { %3242 = vrsqrt.f32 %v169_v24  ;;  %vm179_vm4 = vcmp.eq.f32.partialorder %v169_v24, inf  ;;  %v182_v33 = vand.u32 2147483648, %v169_v24  ;;  %vm181_vm5 = vcmp.eq.f32.partialorder %v169_v24, 0.0 }
 0x150   :  { %v3241_v25 = vpop.eup %3240 }
 0x151   :  { %v171_v26 = vmul.f32 %v3241_v25, %v168_v22 }
 0x153   :  { %v173_v28 = vsel %vm172_vm2, %v168_v22, %v171_v26  ;;  %vm1937_vm2 = vcmask 130048  }
 0x154   :  { %v3243_v29 = vpop.eup %3242  ;;  %v176_v30 = vsel %vm174_vm3, %v175_v27, %v173_v28 }
 0x155   :  { %v184_v31 = vadd.f32 1e-06, %v176_v30  ;;  %v178_v32 = vmul.f32 %v3243_v29, %v169_v24 }
 0x157   :  { %3244 = vrcp.f32 %v184_v31  ;;  %v180_v34 = vsel %vm179_vm4, %v169_v24, %v178_v32  ;;  %v135_v24 = vsel %vm133_vm8, -1e+09, %v3397_v17 }
 0x158   :  { %v183_v35 = vsel %vm181_vm5, %v182_v33, %v180_v34 }
 0x159   :  { %v185_v36 = vadd.f32 1e-06, %v183_v35 }
 0x15b   :  { %3246 = vrcp.f32 %v185_v36 }
 0x164   :  { %v3245_v37 = vpop.eup %3244 }
 0x165   :  { %v188_v38 = vmul.f32 %v3245_v37, %v158_v6 }
 0x167   :  { %v194_v42 = vmul.f32 %v2781_v39, %v188_v38 }
 0x168   :  { %v3247_v40 = vpop.eup %3246 }
 0x169   :  { %v189_v41 = vmul.f32 %v3247_v40, %v159_v10  ;;  %v200_v45 = vadd.f32 %v2782_v43, %v194_v42 }
 0x16b   :  { %v195_v44 = vmul.f32 %v2781_v39, %v189_v41 }
 0x16d   :  { %v201_v46 = vadd.f32 %v2782_v43, %v195_v44 }
 0x16f   :  { %v202_v47 = vpack.c.bf16 %v201_v46, %v200_v45 }
 0x171   :  { %2943 = vmatmul.mubr.msk.bf16.vlgmr.msra.gmra.mxu1 %vm148_vm0, %v202_v47 }
 0x172   :  { %2948 = vmatprep.mubr.msk.bf16.mxu1 %vm3398_vm1, %v3397_v17 }
 0x231   :  { %v244_v49 = vpop.f32.mrf.mxu1 }
 0x232   :  { %v245_v50 = vadd.f32 %v2783_v48, %v244_v49 }
 0x233   :  { %v2944_v51 = vpop.f32.mrf.mxu1 }
 0x234   :  { %v3483_v52 = vpack.c.bf16 %v245_v50, %v245_v50 }
 0x235   :  { %v247_v53 = vpop.f32.mrf.mxu1 }
 0x236   :  { %v248_v54 = vadd.f32 %v2783_v48, %v247_v53  ;;  %254 = vrot.lane.b32.xlu0 %v3483_v52, %s3399_s0 }
 0x237   :  { %v2945_v55 = vpop.f32.mrf.mxu1 }
 0x238   :  { %v3487_v56 = vpack.c.bf16 %v248_v54, %v248_v54 }
 0x23a   :  { %352 = vrot.lane.b32.xlu0 %v3483_v52, %s3400_s5  ;;  %304 = vrot.lane.b32.xlu1 %v3487_v56, %s3399_s0 }
 0x23e   :  { %454 = vrot.lane.b32.xlu0 %v3483_v52, %s3401_s16  ;;  %354 = vrot.lane.b32.xlu1 %v3483_v52, %s3402_s17 }
 0x242   :  { %452 = vrot.lane.b32.xlu0 %v3483_v52, %s3403_s18  ;;  %404 = vrot.lane.b32.xlu1 %v3487_v56, %s3402_s17 }
 0x246   :  { %554 = vrot.lane.b32.xlu0 %v3483_v52, %s3404_s19  ;;  %402 = vrot.lane.b32.xlu1 %v3487_v56, %s3400_s5 }
 0x24a   :  { %552 = vrot.lane.b32.xlu0 %v3483_v52, %s3405_s20  ;;  %504 = vrot.lane.b32.xlu1 %v3487_v56, %s3401_s16 }
 0x24e   :  { %502 = vrot.lane.b32.xlu1 %v3487_v56, %s3403_s18 }
 0x252   :  { %604 = vrot.lane.b32.xlu1 %v3487_v56, %s3404_s19 }
 0x256   :  { %602 = vrot.lane.b32.xlu1 %v3487_v56, %s3405_s20 }
 0x2a8   :  { %v255_v57 = vpop.permute.xlu0 %254 }
 0x2a9   :  { %v261_v58 = vsel %vm256_vm6, %v255_v57, 0 }
 0x2aa   :  { %2947 = vmatpush3.bf16.xpose.msra.mxu1 %v261_v58 }
 0x2ab   :  { %2958 = vmatprep.subr.bf16.mxu1 %v3397_v17 }
 0x2ac   :  { %v353_v59 = vpop.permute.xlu0 %352  ;;  %v305_v60 = vpop.permute.xlu1 %304 }
 0x2ad   :  { %v310_v61 = vsel %vm256_vm6, %v305_v60, 0 }
 0x2ae   :  { %2953 = vmatpush3.bf16.xpose.msra.mxu0 %v310_v61 }
 0x2af   :  { %2964 = vmatprep.subr.bf16.mxu0 %v3397_v17 }
 0x2b0   :  { %v355_v62 = vpop.permute.xlu1 %354  ;;  %v455_v2 = vpop.permute.xlu0 %454 }
 0x2b1   :  { %v360_v63 = vsel %vm256_vm6, %v355_v62, 0  ;;  %2949 = vmatmul.mubr.msk.bf16.vlgmr.msra.gmra.mxu1 %vm256_vm6, %v3483_v52  ;;  %v460_v7 = vsel %vm256_vm6, %v455_v2, 0 }
 0x2b2   :  { %2959 = vmatpush3.bf16.xpose.msra.mxu1 %v360_v63  ;;  %2960 = vmatprep.mubr.msk.bf16.mxu1 %vm3398_vm1, %v3397_v17 }
 0x2b3   :  { %2970 = vmatprep.subr.bf16.mxu1 %v3397_v17 }
 0x2b4   :  { %v405_v3 = vpop.permute.xlu1 %404  ;;  %v453_v5 = vpop.permute.xlu0 %452 }
 0x2b5   :  { %v410_v4 = vsel %vm256_vm6, %v405_v3, 0  ;;  %2955 = vmatmul.mubr.msk.bf16.vlgmr.msra.gmra.mxu0 %vm256_vm6, %v3487_v56 }
 0x2b6   :  { %2965 = vmatpush3.bf16.xpose.msra.mxu0 %v410_v4  ;;  %2966 = vmatprep.mubr.msk.bf16.mxu0 %vm3398_vm1, %v3397_v17 }
 0x2b7   :  { %2976 = vmatprep.subr.bf16.mxu0 %v3397_v17 }
 0x2b8   :  { %v403_v6 = vpop.permute.xlu1 %402  ;;  %v555_v10 = vpop.permute.xlu0 %554 }
 0x2b9   :  { %2961 = vmatmul.mubr.msk.bf16.vlgmr.msra.gmra.mxu1 %vm256_vm6, %v353_v59  ;;  %v560_v12 = vsel %vm256_vm6, %v555_v10, 0 }
 0x2ba   :  { %2971 = vmatpush3.bf16.xpose.msra.mxu1 %v460_v7  ;;  %2972 = vmatprep.mubr.msk.bf16.mxu1 %vm3398_vm1, %v3397_v17 }
 0x2bb   :  { %2982 = vmatprep.subr.bf16.mxu1 %v3397_v17 }
 0x2bc   :  { %v505_v8 = vpop.permute.xlu1 %504  ;;  %v553_v15 = vpop.permute.xlu0 %552 }
 0x2bd   :  { %v510_v9 = vsel %vm256_vm6, %v505_v8, 0  ;;  %2967 = vmatmul.mubr.msk.bf16.vlgmr.msra.gmra.mxu0 %vm256_vm6, %v403_v6 }
 0x2be   :  { %2977 = vmatpush3.bf16.xpose.msra.mxu0 %v510_v9  ;;  %2978 = vmatprep.mubr.msk.bf16.mxu0 %vm3398_vm1, %v3397_v17 }
 0x2bf   :  { %2988 = vmatprep.subr.bf16.mxu0 %v3397_v17 }
 0x2c0   :  { %v503_v11 = vpop.permute.xlu1 %502 }
 0x2c1   :  { %2973 = vmatmul.mubr.msk.bf16.vlgmr.msra.gmra.mxu1 %vm256_vm6, %v453_v5 }
 0x2c2   :  { %2983 = vmatpush3.bf16.xpose.msra.mxu1 %v560_v12  ;;  %2984 = vmatprep.mubr.msk.bf16.mxu1 %vm3398_vm1, %v3397_v17 }
 0x2c3   :  { %2994 = vmatprep.subr.bf16.mxu1 %v3397_v17 }
 0x2c4   :  { %v605_v13 = vpop.permute.xlu1 %604 }
 0x2c5   :  { %v610_v14 = vsel %vm256_vm6, %v605_v13, 0  ;;  %2979 = vmatmul.mubr.msk.bf16.vlgmr.msra.gmra.mxu0 %vm256_vm6, %v503_v11 }
 0x2c6   :  { %2989 = vmatpush3.bf16.xpose.msra.mxu0 %v610_v14  ;;  %2990 = vmatprep.mubr.msk.bf16.mxu0 %vm3398_vm1, %v3397_v17 }
 0x2c7   :  { %3000 = vmatprep.subr.bf16.mxu0 %v3397_v17 }
 0x2c8   :  { %v603_v16 = vpop.permute.xlu1 %602 }
 0x2c9   :  { %2985 = vmatmul.mubr.msk.bf16.vlgmr.msra.gmra.mxu1 %vm256_vm6, %v553_v15 }
 0x2ca   :  { %2996 = vmatprep.mubr.msk.bf16.mxu1 %vm3398_vm1, %v3397_v17 }
 0x2cd   :  { %2991 = vmatmul.mubr.msk.bf16.vlgmr.msra.gmra.mxu0 %vm256_vm6, %v603_v16 }
 0x2ce   :  { %3002 = vmatprep.mubr.msk.bf16.mxu0 %vm3398_vm1, %v3397_v17 }
 0x371   :  { %v297_v21 = vpop.f32.mrf.mxu1 }
 0x372   :  { %v3564_v22 = vadd.f32 %v297_v21, %v134_v20 }
 0x373   :  { %v2950_v23 = vpop.f32.mrf.mxu1 }
 0x374   :  { %v660_v25 = vsel %vm256_vm6, %v3564_v22, -inf }
 0x375   :  { %v346_v26 = vpop.f32.mrf.mxu0  ;;  %661 = vmax.xlane.f32.xlu0 %v660_v25  ;;  %v300_v27 = vpop.f32.mrf.mxu1 }
 0x376   :  { %v656_v28 = vadd.f32 %v346_v26, %v135_v24 }
 0x377   :  { %v2951_v29 = vpop.f32.mrf.mxu1  ;;  %v2956_v30 = vpop.f32.mrf.mxu0 }
 0x378   :  { %v672_v31 = vsel %vm256_vm6, %v656_v28, -inf }
 0x379   :  { %673 = vmax.xlane.f32.xlu1 %v672_v31  ;;  %v349_v32 = vpop.f32.mrf.mxu0  ;;  %v396_v33 = vpop.f32.mrf.mxu1 }
 0x37a   :  { %v653_v34 = vadd.f32 %v396_v33, %v134_v20 }
 0x37b   :  { %v2957_v35 = vpop.f32.mrf.mxu0  ;;  %v2962_v36 = vpop.f32.mrf.mxu1 }
 0x37c   :  { %v663_v37 = vsel %vm256_vm6, %v653_v34, -inf }
 0x37d   :  { %v446_v38 = vpop.f32.mrf.mxu0  ;;  %664 = vmax.xlane.f32.xlu0 %v663_v37  ;;  %v399_v39 = vpop.f32.mrf.mxu1 }
 0x37e   :  { %v3571_v40 = vadd.f32 %v446_v38, %v135_v24 }
 0x37f   :  { %v2963_v41 = vpop.f32.mrf.mxu1  ;;  %v2968_v42 = vpop.f32.mrf.mxu0 }
 0x380   :  { %v675_v43 = vsel %vm256_vm6, %v3571_v40, -inf }
 0x381   :  { %v449_v44 = vpop.f32.mrf.mxu0  ;;  %676 = vmax.xlane.f32.xlu0 %v675_v43  ;;  %v496_v45 = vpop.f32.mrf.mxu1 }
 0x382   :  { %v3575_v46 = vadd.f32 %v496_v45, %v134_v20 }
 0x383   :  { %v2969_v47 = vpop.f32.mrf.mxu0  ;;  %v2974_v48 = vpop.f32.mrf.mxu1 }
 0x384   :  { %v666_v49 = vsel %vm256_vm6, %v3575_v46, -inf }
 0x385   :  { %v546_v50 = vpop.f32.mrf.mxu0  ;;  %667 = vmax.xlane.f32.xlu0 %v666_v49  ;;  %v499_v51 = vpop.f32.mrf.mxu1 }
 0x386   :  { %v3579_v53 = vadd.f32 %v546_v50, %v135_v24 }
 0x387   :  { %v2975_v54 = vpop.f32.mrf.mxu1  ;;  %v2980_v55 = vpop.f32.mrf.mxu0 }
 0x388   :  { %v678_v57 = vsel %vm256_vm6, %v3579_v53, -inf }
 0x389   :  { %679 = vmax.xlane.f32.xlu1 %v678_v57  ;;  %v549_v58 = vpop.f32.mrf.mxu0  ;;  %v596_v59 = vpop.f32.mrf.mxu1 }
 0x38a   :  { %v3583_v60 = vadd.f32 %v596_v59, %v134_v20 }
 0x38b   :  { %v2981_v61 = vpop.f32.mrf.mxu0  ;;  %v2986_v62 = vpop.f32.mrf.mxu1 }
 0x38c   :  { %v669_v63 = vsel %vm256_vm6, %v3583_v60, -inf }
 0x38d   :  { %v646_v2 = vpop.f32.mrf.mxu0  ;;  %670 = vmax.xlane.f32.xlu0 %v669_v63  ;;  %v599_v3 = vpop.f32.mrf.mxu1 }
 0x38e   :  { %v659_v8 = vadd.f32 %v646_v2, %v135_v24 }
 0x38f   :  { %v2987_v4 = vpop.f32.mrf.mxu1  ;;  %v2992_v5 = vpop.f32.mrf.mxu0 }
 0x390   :  { %v681_v9 = vsel %vm256_vm6, %v659_v8, -inf }
 0x391   :  { %v649_v6 = vpop.f32.mrf.mxu0 }
 0x393   :  { %v2993_v7 = vpop.f32.mrf.mxu0 }
 0x39a   :  { %805 = vrot.lane.b32.xlu1 %v3487_v56, %s3406_s2 }
 0x39e   :  { %853 = vrot.lane.b32.xlu1 %v3483_v52, %s3407_s25 }
 0x3a3   :  { %756 = vrot.lane.b32.xlu0 %v3483_v52, %s3406_s2 }
 0x3c2   :  { %682 = vmax.xlane.f32.xlu1 %v681_v9 }
 0x3d3   :  { %901 = vrot.lane.b32.xlu1 %v3487_v56, %s3407_s25 }
 0x3fe   :  { %v662_v10 = vpop.xlane.xlu0 %661 }
 0x3ff   :  { %v684_v11 = vsub.f32 %v3564_v22, %v662_v10 }
 0x401   :  { %v692_v12 = vmul.f32 1.442695, %v684_v11 }
 0x402   :  { %v674_v13 = vpop.xlane.xlu1 %673 }
 0x403   :  { %3248 = vpow2.f32 %v692_v12  ;;  %v688_v14 = vsub.f32 %v656_v28, %v674_v13 }
 0x405   :  { %v700_v15 = vmul.f32 1.442695, %v688_v14 }
 0x406   :  { %v665_v16 = vpop.xlane.xlu0 %664 }
 0x407   :  { %3250 = vpow2.f32 %v700_v15  ;;  %v685_v18 = vsub.f32 %v653_v34, %v665_v16 }
 0x409   :  { %v694_v19 = vmul.f32 1.442695, %v685_v18 }
 0x40a   :  { %v677_v20 = vpop.xlane.xlu0 %676 }
 0x40b   :  { %3252 = vpow2.f32 %v694_v19  ;;  %v689_v34 = vsub.f32 %v3571_v40, %v677_v20 }
 0x40d   :  { %v702_v36 = vmul.f32 1.442695, %v689_v34  ;;  %v71_v34 = vld [vmem:[#allocation4 + $0x20] sm:$0xff] }
 0x40e   :  { %v668_v24 = vpop.xlane.xlu0 %667 }
 0x40f   :  { %v686_v35 = vsub.f32 %v3575_v46, %v668_v24  ;;  %3254 = vpow2.f32 %v702_v36 }
 0x410   :  { %v3593_v21 = vpop.eup %3248 }
 0x411   :  { %v708_v23 = vsel %vm256_vm6, %v3593_v21, 0.0  ;;  %v696_v38 = vmul.f32 1.442695, %v686_v35  ;;  %v75_v35 = vpack.c.bf16 %v71_v34, %v71_v34 }
 0x412   :  { %v680_v25 = vpop.xlane.xlu1 %679  ;;  %709 = vadd.xlane.f32.xlu0 %v708_v23 }
 0x413   :  { %v690_v37 = vsub.f32 %v3579_v53, %v680_v25  ;;  %3256 = vpow2.f32 %v696_v38 }
 0x414   :  { %v3597_v22 = vpop.eup %3250 }
 0x415   :  { %v720_v26 = vsel %vm256_vm6, %v3597_v22, 0.0  ;;  %v704_v39 = vmul.f32 1.442695, %v690_v37  ;;  %v1149_v37 = vsel %vm761_vm9, %v75_v35, 0 }
 0x416   :  { %721 = vadd.xlane.f32.xlu1 %v720_v26  ;;  %v806_v27 = vpop.permute.xlu1 %805  ;;  %v671_v28 = vpop.xlane.xlu0 %670 }
 0x417   :  { %v811_v29 = vsel %vm761_vm9, %v806_v27, 0  ;;  %v687_v41 = vsub.f32 %v3583_v60, %v671_v28  ;;  %3258 = vpow2.f32 %v704_v39 }
 0x418   :  { %v3602_v30 = vpop.eup %3252  ;;  %3001 = vmatpush3.bf16.msra.mxu0 %v811_v29 }
 0x419   :  { %v711_v31 = vsel %vm256_vm6, %v3602_v30, 0.0  ;;  %3012 = vmatprep.subr.bf16.mxu0 %v3397_v17  ;;  %v698_v42 = vmul.f32 1.442695, %v687_v41 }
 0x41a   :  { %712 = vadd.xlane.f32.xlu0 %v711_v31  ;;  %v757_v32 = vpop.permute.xlu0 %756  ;;  %v854_v44 = vpop.permute.xlu1 %853 }
 0x41b   :  { %v763_v33 = vsel %vm761_vm9, %v757_v32, 0  ;;  %3260 = vpow2.f32 %v698_v42  ;;  %v859_v4 = vsel %vm761_vm9, %v854_v44, 0  ;;  %v72_v42 = vld [vmem:[#allocation4 + $0x28] sm:$0xff] }
 0x41c   :  { %2995 = vmatpush3.bf16.msra.mxu1 %v763_v33  ;;  %v3615_v43 = vpop.eup %3254 }
 0x41d   :  { %3006 = vmatprep.subr.bf16.mxu1 %v3397_v17  ;;  %v723_v40 = vsel %vm256_vm6, %v3615_v43, 0.0 }
 0x420   :  { %v3617_v45 = vpop.eup %3256 }
 0x421   :  { %v714_v51 = vsel %vm256_vm6, %v3617_v45, 0.0 }
 0x424   :  { %v3621_v46 = vpop.eup %3258 }
 0x425   :  { %v726_v50 = vsel %vm256_vm6, %v3621_v46, 0.0 }
 0x427   :  { %997 = vrot.lane.b32.xlu1 %v3487_v56, %s3408_s26 }
 0x428   :  { %v3627_v53 = vpop.eup %3260 }
 0x429   :  { %v717_v54 = vsel %vm256_vm6, %v3627_v53, 0.0 }
 0x430   :  { %949 = vrot.lane.b32.xlu0 %v3483_v52, %s3408_s26 }
 0x44b   :  { %v683_v47 = vpop.xlane.xlu1 %682  ;;  %724 = vadd.xlane.f32.xlu1 %v723_v40 }
 0x44c   :  { %v691_v48 = vsub.f32 %v659_v8, %v683_v47 }
 0x44e   :  { %v706_v49 = vmul.f32 1.442695, %v691_v48 }
 0x44f   :  { %727 = vadd.xlane.f32.xlu1 %v726_v50  ;;  %715 = vadd.xlane.f32.xlu0 %v714_v51  ;;  %v902_v58 = vpop.permute.xlu1 %901 }
 0x450   :  { %3262 = vpow2.f32 %v706_v49  ;;  %v907_v6 = vsel %vm761_vm9, %v902_v58, 0 }
 0x453   :  { %718 = vadd.xlane.f32.xlu0 %v717_v54 }
 0x45d   :  { %v3631_v55 = vpop.eup %3262 }
 0x45e   :  { %v729_v57 = vsel %vm256_vm6, %v3631_v55, 0.0 }
 0x45f   :  { %730 = vadd.xlane.f32.xlu1 %v729_v57 }
 0x469   :  { %1045 = vrot.lane.b32.xlu0 %v3483_v52, %s3409_s27 }
 0x470   :  { %1093 = vrot.lane.b32.xlu1 %v3487_v56, %s3409_s27 }
 0x49b   :  { %v710_v59 = vpop.xlane.xlu0 %709 }
 0x49c   :  { %3264 = vrcp.f32 %v710_v59 }
 0x49f   :  { %v722_v60 = vpop.xlane.xlu1 %721 }
 0x4a0   :  { %3266 = vrcp.f32 %v722_v60 }
 0x4a3   :  { %v713_v61 = vpop.xlane.xlu0 %712  ;;  %v998_v11 = vpop.permute.xlu1 %997 }
 0x4a4   :  { %3268 = vrcp.f32 %v713_v61  ;;  %v1003_v23 = vsel %vm761_vm9, %v998_v11, 0 }
 0x4a7   :  { %v950_v8 = vpop.permute.xlu0 %949 }
 0x4a8   :  { %v955_v10 = vsel %vm761_vm9, %v950_v8, 0 }
 0x4a9   :  { %v3265_v62 = vpop.eup %3264 }
 0x4aa   :  { %v740_v63 = vmul.f32 %v3265_v62, %v3593_v21  ;;  %v74_v62 = vld [vmem:[#allocation4 + $0x38] sm:$0xff] }
 0x4ac   :  { %v748_v2 = vpack.c.bf16 %v740_v63, %v740_v63  ;;  %v78_v63 = vpack.c.bf16 %v74_v62, %v74_v62 }
 0x4ad   :  { %v3267_v3 = vpop.eup %3266 }
 0x4ae   :  { %2997 = vmatmul.mubr.msk.bf16.vlgmr.msra.gmra.mxu1 %vm256_vm6, %v748_v2  ;;  %v744_v52 = vmul.f32 %v3267_v3, %v3597_v22 }
 0x4af   :  { %3007 = vmatpush3.bf16.msra.mxu1 %v859_v4  ;;  %3008 = vmatprep.mubr.msk.bf16.mxu1 %vm3398_vm1, %v3397_v17  ;;  %v1290_v4 = vsel %vm761_vm9, %v78_v63, 0 }
 0x4b0   :  { %v752_v56 = vpack.c.bf16 %v744_v52, %v744_v52  ;;  %3018 = vmatprep.subr.bf16.mxu1 %v3397_v17 }
 0x4b1   :  { %v3269_v5 = vpop.eup %3268 }
 0x4b2   :  { %3003 = vmatmul.mubr.msk.bf16.vlgmr.msra.gmra.mxu0 %vm256_vm6, %v752_v56  ;;  %v741_v7 = vmul.f32 %v3269_v5, %v3602_v30 }
 0x4b3   :  { %3013 = vmatpush3.bf16.msra.mxu0 %v907_v6  ;;  %3014 = vmatprep.mubr.msk.bf16.mxu0 %vm3398_vm1, %v3397_v17 }
 0x4b4   :  { %v749_v9 = vpack.c.bf16 %v741_v7, %v741_v7  ;;  %3024 = vmatprep.subr.bf16.mxu0 %v3397_v17 }
 0x4b6   :  { %3009 = vmatmul.mubr.msk.bf16.vlgmr.msra.gmra.mxu1 %vm256_vm6, %v749_v9 }
 0x4b7   :  { %3019 = vmatpush3.bf16.msra.mxu1 %v955_v10  ;;  %3020 = vmatprep.mubr.msk.bf16.mxu1 %vm3398_vm1, %v3397_v17 }
 0x4b8   :  { %3030 = vmatprep.subr.bf16.mxu1 %v3397_v17 }
 0x4d4   :  { %v725_v12 = vpop.xlane.xlu1 %724 }
 0x4d5   :  { %3270 = vrcp.f32 %v725_v12 }
 0x4d8   :  { %v728_v13 = vpop.xlane.xlu1 %727  ;;  %v716_v14 = vpop.xlane.xlu0 %715 }
 0x4d9   :  { %3272 = vrcp.f32 %v728_v13 }
 0x4da   :  { %3274 = vrcp.f32 %v716_v14 }
 0x4dc   :  { %v719_v15 = vpop.xlane.xlu0 %718 }
 0x4dd   :  { %3276 = vrcp.f32 %v719_v15 }
 0x4e0   :  { %v1046_v22 = vpop.permute.xlu0 %1045 }
 0x4e1   :  { %v1051_v29 = vsel %vm761_vm9, %v1046_v22, 0 }
 0x4e2   :  { %v3271_v16 = vpop.eup %3270 }
 0x4e3   :  { %v745_v18 = vmul.f32 %v3271_v16, %v3615_v43  ;;  %v76_v43 = vpack.c.bf16 %v72_v42, %v72_v42 }
 0x4e5   :  { %v753_v19 = vpack.c.bf16 %v745_v18, %v745_v18  ;;  %v1196_v44 = vsel %vm761_vm9, %v76_v43, 0 }
 0x4e6   :  { %v3273_v20 = vpop.eup %3272 }
 0x4e7   :  { %v3275_v21 = vpop.eup %3274  ;;  %3015 = vmatmul.mubr.msk.bf16.vlgmr.msra.gmra.mxu0 %vm256_vm6, %v753_v19  ;;  %v746_v26 = vmul.f32 %v3273_v20, %v3621_v46 }
 0x4e8   :  { %3025 = vmatpush3.bf16.msra.mxu0 %v1003_v23  ;;  %v731_v24 = vpop.xlane.xlu1 %730  ;;  %v742_v25 = vmul.f32 %v3275_v21, %v3617_v45  ;;  %3026 = vmatprep.mubr.msk.bf16.mxu0 %vm3398_vm1, %v3397_v17  ;;  %v73_v45 = vld [vmem:[#allocation4 + $0x30] sm:$0xff] }
 0x4e9   :  { %3278 = vrcp.f32 %v731_v24  ;;  %3036 = vmatprep.subr.bf16.mxu0 %v3397_v17  ;;  %v754_v32 = vpack.c.bf16 %v746_v26, %v746_v26  ;;  %v77_v46 = vpack.c.bf16 %v73_v45, %v73_v45 }
 0x4ea   :  { %v750_v27 = vpack.c.bf16 %v742_v25, %v742_v25  ;;  %v3277_v28 = vpop.eup %3276 }
 0x4eb   :  { %v743_v33 = vmul.f32 %v3277_v28, %v3627_v53  ;;  %v1243_v51 = vsel %vm761_vm9, %v77_v46, 0  ;;  %v2805_v46 = vld [vmem:[#allocation6 + $0x3] ss:$0 sm:$0xff] }
 0x4ec   :  { %3021 = vmatmul.mubr.msk.bf16.vlgmr.msra.gmra.mxu1 %vm256_vm6, %v750_v27  ;;  %v1094_v30 = vpop.permute.xlu1 %1093 }
 0x4ed   :  { %3031 = vmatpush3.bf16.msra.mxu1 %v1051_v29  ;;  %v1099_v31 = vsel %vm761_vm9, %v1094_v30, 0  ;;  %3032 = vmatprep.mubr.msk.bf16.mxu1 %vm3398_vm1, %v3397_v17  ;;  %v751_v36 = vpack.c.bf16 %v743_v33, %v743_v33 }
 0x4ee   :  { %3042 = vmatprep.subr.bf16.mxu1 %v3397_v17 }
 0x4ef   :  { %3027 = vmatmul.mubr.msk.bf16.vlgmr.msra.gmra.mxu0 %vm256_vm6, %v754_v32 }
 0x4f0   :  { %3037 = vmatpush3.bf16.msra.mxu0 %v1099_v31  ;;  %3038 = vmatprep.mubr.msk.bf16.mxu0 %vm3398_vm1, %v3397_v17 }
 0x4f1   :  { %3048 = vmatprep.subr.bf16.mxu0 %v3397_v17 }
 0x4f4   :  { %3033 = vmatmul.mubr.msk.bf16.vlgmr.msra.gmra.mxu1 %vm256_vm6, %v751_v36 }
 0x4f5   :  { %3043 = vmatpush3.bf16.msra.mxu1 %v1149_v37  ;;  %3044 = vmatprep.mubr.msk.bf16.mxu1 %vm3398_vm1, %v3397_v17 }
 0x4f6   :  { %v3279_v38 = vpop.eup %3278  ;;  %3054 = vmatprep.subr.bf16.mxu1 %v3397_v17 }
 0x4f7   :  { %v747_v39 = vmul.f32 %v3279_v38, %v3631_v55 }
 0x4f9   :  { %v755_v41 = vpack.c.bf16 %v747_v39, %v747_v39 }
 0x4fb   :  { %3039 = vmatmul.mubr.msk.bf16.vlgmr.msra.gmra.mxu0 %vm256_vm6, %v755_v41 }
 0x4fc   :  { %3050 = vmatprep.mubr.msk.bf16.mxu0 %vm3398_vm1, %v3397_v17  ;;  %3049 = vmatpush3.bf16.msra.mxu0 %v1196_v44 }
 0x4fd   :  { %3060 = vmatprep.subr.bf16.mxu0 %v3397_v17 }
 0x56e   :  { %v799_v40 = vpop.f32.mrf.mxu1 }
 0x570   :  { %v2998_v47 = vpop.f32.mrf.mxu1 }
 0x572   :  { %v802_v48 = vpop.f32.mrf.mxu1  ;;  %v847_v49 = vpop.f32.mrf.mxu0 }
 0x573   :  { %v1141_v50 = vpack.c.bf16 %v847_v49, %v799_v40 }
 0x574   :  { %v2999_v53 = vpop.f32.mrf.mxu1  ;;  %v3004_v54 = vpop.f32.mrf.mxu0 }
 0x575   :  { %3045 = vmatmul.mubr.msk.bf16.vlgmr.msra.gmra.mxu1 %vm256_vm6, %v1141_v50 }
 0x576   :  { %v850_v55 = vpop.f32.mrf.mxu0  ;;  %v895_v57 = vpop.f32.mrf.mxu1  ;;  %3055 = vmatpush3.bf16.msra.mxu1 %v1243_v51  ;;  %3056 = vmatprep.mubr.msk.bf16.mxu1 %vm3398_vm1, %v3397_v17 }
 0x577   :  { %3066 = vmatprep.subr.bf16.mxu1 %v3397_v17 }
 0x578   :  { %v3005_v58 = vpop.f32.mrf.mxu0  ;;  %v3010_v59 = vpop.f32.mrf.mxu1 }
 0x57a   :  { %v898_v60 = vpop.f32.mrf.mxu1 }
 0x57c   :  { %v3011_v61 = vpop.f32.mrf.mxu1 }
 0x5a7   :  { %v943_v2 = vpop.f32.mrf.mxu0 }
 0x5a8   :  { %v1142_v3 = vpack.c.bf16 %v943_v2, %v895_v57 }
 0x5a9   :  { %v3016_v52 = vpop.f32.mrf.mxu0 }
 0x5aa   :  { %3051 = vmatmul.mubr.msk.bf16.vlgmr.msra.gmra.mxu0 %vm256_vm6, %v1142_v3 }
 0x5ab   :  { %v946_v56 = vpop.f32.mrf.mxu0  ;;  %3061 = vmatpush3.bf16.msra.mxu0 %v1290_v4  ;;  %3062 = vmatprep.mubr.msk.bf16.mxu0 %vm3398_vm1, %v3397_v17 }
 0x5ac   :  { %v991_v5 = vpop.f32.mrf.mxu1 }
 0x5ad   :  { %v3017_v6 = vpop.f32.mrf.mxu0 }
 0x5ae   :  { %v3022_v7 = vpop.f32.mrf.mxu1 }
 0x5af   :  { %v1039_v8 = vpop.f32.mrf.mxu0 }
 0x5b0   :  { %v994_v9 = vpop.f32.mrf.mxu1  ;;  %v1143_v10 = vpack.c.bf16 %v1039_v8, %v991_v5  ;;  %v87_v8 = vld [vmem:[#allocation4 + $0x70] sm:$0xff] }
 0x5b1   :  { %v3028_v11 = vpop.f32.mrf.mxu0  ;;  %v88_v9 = vld [vmem:[#allocation4 + $0x78] sm:$0xff] }
 0x5b2   :  { %v3023_v12 = vpop.f32.mrf.mxu1  ;;  %3057 = vmatmul.mubr.msk.bf16.vlgmr.msra.gmra.mxu1 %vm256_vm6, %v1143_v10  ;;  %v90_v10 = vpack.c.bf16 %v88_v9, %v87_v8  ;;  %v85_v11 = vld [vmem:[#allocation4 + $0x60] sm:$0xff] }
 0x5b3   :  { %v1042_v13 = vpop.f32.mrf.mxu0  ;;  %3070 = vmatprep.mubr.msk.bf16.mxu1 %vm3398_vm1, %v3397_v17  ;;  %v86_v12 = vld [vmem:[#allocation4 + $0x68] sm:$0xff] }
 0x5b4   :  { %v1087_v14 = vpop.f32.mrf.mxu1  ;;  %3074 = vmatprep.subr.bf16.mxu0 %v90_v10  ;;  %v89_v13 = vpack.c.bf16 %v86_v12, %v85_v11 }
 0x5b5   :  { %v3029_v15 = vpop.f32.mrf.mxu0 }
 0x5b6   :  { %v3034_v16 = vpop.f32.mrf.mxu1  ;;  %v145_v15 = vld [vmem:[#allocation2 + $0x8] sm:$0xff] }
 0x5b8   :  { %v1090_v18 = vpop.f32.mrf.mxu1 }
 0x5b9   :  { %v146_v18 = vld [vmem:[#allocation2 + $0x10] sm:$0xff] }
 0x5ba   :  { %v3035_v19 = vpop.f32.mrf.mxu1 }
 0x5bb   :  { %v1135_v20 = vpop.f32.mrf.mxu0  ;;  %v147_v19 = vld [vmem:[#allocation2 + $0x18] sm:$0xff] }
 0x5bc   :  { %v1144_v21 = vpack.c.bf16 %v1135_v20, %v1087_v14  ;;  %v144_v14 = vld [vmem:[#allocation2] sm:$0xff]  ;;  %v1457_v20 = vpack.c.bf16 %v147_v19, %v146_v18 }
 0x5bd   :  { %v3040_v23 = vpop.f32.mrf.mxu0  ;;  %v1456_v16 = vpack.c.bf16 %v145_v15, %v144_v14 }
 0x5be   :  { %3063 = vmatmul.mubr.msk.bf16.vlgmr.msra.gmra.mxu0 %vm256_vm6, %v1144_v21  ;;  %v81_v21 = vld [vmem:[#allocation4 + $0x50] sm:$0xff]  ;;  %v82_v23 = vld [vmem:[#allocation4 + $0x58] sm:$0xff] }
 0x5bf   :  { %v1138_v24 = vpop.f32.mrf.mxu0  ;;  %3075 = vmatpush3.bf16.msra.mxu0 %v90_v10  ;;  %3078 = vmatprep.mubr.msk.bf16.mxu0 %vm148_vm0, %v1456_v16 }
 0x5c0   :  { %3076 = vmatprep.subr.bf16.mxu0 %v89_v13  ;;  %v79_v24 = vld [vmem:[#allocation4 + $0x40] sm:$0xff] }
 0x5c1   :  { %v3041_v25 = vpop.f32.mrf.mxu0 }
 0x5c2   :  { %v84_v25 = vpack.c.bf16 %v82_v23, %v81_v21 }
 0x5c3   :  { %3077 = vmatpush3.bf16.msra.mxu0 %v89_v13 }
 0x5c4   :  { %3088 = vmatprep.subr.bf16.mxu0 %v3397_v17  ;;  %3067 = vmatpush3.bf16.msra.mxu1 %v84_v25 }
 0x5c5   :  { %3068 = vmatprep.subr.bf16.mxu1 %v3397_v17 }
 0x5c6   :  { %3079 = vmatmul.mubr.msk.bf16.vlgmr.msra.gmra.mxu0 %vm148_vm0, %v1457_v20 }
 0x5c7   :  { %3090 = vmatprep.mubr.msk.bf16.mxu0 %vm3398_vm1, %v3397_v17 }
 0x635   :  { %v1185_v22 = vpop.f32.mrf.mxu1 }
 0x636   :  { %v1333_v38 = vsel %vm148_vm0, %v1185_v22, 0.0  ;;  %v80_v22 = vld [vmem:[#allocation4 + $0x48] sm:$0xff] }
 0x637   :  { %v3046_v26 = vpop.f32.mrf.mxu1 }
 0x638   :  { %v83_v26 = vpack.c.bf16 %v80_v22, %v79_v24 }
 0x639   :  { %v1188_v27 = vpop.f32.mrf.mxu1 }
 0x63a   :  { %v1340_v45 = vsel %vm148_vm0, %v1188_v27, 0.0  ;;  %3069 = vmatpush3.bf16.msra.mxu1 %v83_v26 }
 0x63b   :  { %v3047_v28 = vpop.f32.mrf.mxu1  ;;  %3082 = vmatprep.subr.bf16.mxu1 %v3397_v17 }
 0x66a   :  { %v1232_v29 = vpop.f32.mrf.mxu0 }
 0x66b   :  { %v1334_v37 = vsel %vm148_vm0, %v1232_v29, 0.0 }
 0x66c   :  { %v3052_v30 = vpop.f32.mrf.mxu0  ;;  %v1335_v41 = vadd.f32 %v1334_v37, %v1333_v38 }
 0x66e   :  { %v1235_v31 = vpop.f32.mrf.mxu0 }
 0x66f   :  { %v1341_v42 = vsel %vm148_vm0, %v1235_v31, 0.0 }
 0x670   :  { %v3053_v32 = vpop.f32.mrf.mxu0  ;;  %v1342_v48 = vadd.f32 %v1341_v42, %v1340_v45 }
 0x672   :  { %v1279_v33 = vpop.f32.mrf.mxu1 }
 0x673   :  { %v1336_v39 = vsel %vm148_vm0, %v1279_v33, 0.0 }
 0x674   :  { %v3058_v34 = vpop.f32.mrf.mxu1  ;;  %v1337_v43 = vadd.f32 %v1336_v39, %v1335_v41 }
 0x676   :  { %v1282_v35 = vpop.f32.mrf.mxu1 }
 0x677   :  { %v1343_v40 = vsel %vm148_vm0, %v1282_v35, 0.0 }
 0x678   :  { %v3059_v36 = vpop.f32.mrf.mxu1  ;;  %v1344_v51 = vadd.f32 %v1343_v40, %v1342_v48  ;;  %v2806_v40 = vld [vmem:[#allocation6 + $0x4] ss:$0 sm:$0xff] }
 0x67e   :  { %v1326_v44 = vpop.f32.mrf.mxu0 }
 0x67f   :  { %v1338_v47 = vsel %vm148_vm0, %v1326_v44, 0.0 }
 0x680   :  { %v1339_v49 = vadd.f32 %v1338_v47, %v1337_v43  ;;  %v3064_v50 = vpop.f32.mrf.mxu0 }
 0x682   :  { %v1351_v53 = vadd.f32 %v2805_v46, %v1339_v49  ;;  %v1329_v54 = vpop.f32.mrf.mxu0  ;;  %v2807_v49 = vld [vmem:[#allocation6 + $0x5] ss:$0 sm:$0xff] }
 0x683   :  { %v1345_v55 = vsel %vm148_vm0, %v1329_v54, 0.0 }
 0x684   :  { %v1346_v57 = vadd.f32 %v1345_v55, %v1344_v51  ;;  %v3065_v58 = vpop.f32.mrf.mxu0  ;;  %v3707_v59 = vadd.f32 %v1351_v53, %v3457_v0 }
 0x686   :  { %v1352_v60 = vadd.f32 %v2805_v46, %v1346_v57  ;;  %v1355_v61 = vsel %vm148_vm0, %v3707_v59, 0.0  ;;  %v3080_v55 = vpop.f32.mrf.mxu0  ;;  %v2810_v57 = vld [vmem:[#allocation6 + $0x7] ss:$0 sm:$0xff] }
 0x687   :  { %1356 = vadd.xlane.f32.xlu0 %v1355_v61 }
 0x688   :  { %v3712_v62 = vadd.f32 %v1352_v60, %v3462_v1  ;;  %v1502_v58 = vpop.f32.mrf.mxu0  ;;  %v1511_v60 = vadd.f32 %v3080_v55, %v2810_v57 }
 0x68a   :  { %v1358_v63 = vsel %vm148_vm0, %v3712_v62, 0.0  ;;  %v3081_v61 = vpop.f32.mrf.mxu0 }
 0x68b   :  { %1359 = vadd.xlane.f32.xlu1 %v1358_v63  ;;  %v1503_v63 = vadd.f32 %v2810_v57, %v1502_v58 }
 0x710   :  { %v1357_v2 = vpop.xlane.xlu0 %1356 }
 0x711   :  { %v1361_v3 = vmul.f32 0.03125, %v1357_v2  ;;  %v1514_v2 = vadd.f32 %v3081_v61, %v2810_v57 }
 0x713   :  { %v3717_v4 = vsub.f32 %v3707_v59, %v1361_v3  ;;  %v1505_v3 = vpop.f32.mrf.mxu0 }
 0x714   :  { %v1360_v52 = vpop.xlane.xlu1 %1359 }
 0x715   :  { %v1362_v0 = vmul.f32 0.03125, %v1360_v52  ;;  %v1365_v56 = vmul.f32 %v3717_v4, %v3717_v4  ;;  %v1506_v52 = vadd.f32 %v2810_v57, %v1505_v3 }
 0x717   :  { %v3722_v5 = vsub.f32 %v3712_v62, %v1362_v0  ;;  %v1367_v1 = vsel %vm148_vm0, %v1365_v56, 0.0  ;;  %v3742_v0 = vpack.c.bf16 %v1506_v52, %v1503_v63 }
 0x718   :  { %1368 = vadd.xlane.f32.xlu0 %v1367_v1  ;;  %v2808_v1 = vld [vmem:[#allocation6 + $0x6] ss:$0 sm:$0xff] }
 0x719   :  { %v1366_v6 = vmul.f32 %v3722_v5, %v3722_v5 }
 0x71b   :  { %v1370_v7 = vsel %vm148_vm0, %v1366_v6, 0.0 }
 0x71c   :  { %1371 = vadd.xlane.f32.xlu0 %v1370_v7 }
 0x732   :  { %1617 = vrot.lane.b32.xlu0 %v3742_v0, %s3400_s5 }
 0x736   :  { %1719 = vrot.lane.b32.xlu0 %v3742_v0, %s3403_s18 }
 0x7a1   :  { %v1369_v27 = vpop.xlane.xlu0 %1368 }
 0x7a2   :  { %v1373_v28 = vmul.f32 0.032258064, %v1369_v27 }
 0x7a4   :  { %3280 = vrsqrt.f32 %v1373_v28  ;;  %vm1377_vm10 = vcmp.eq.f32.partialorder %v1373_v28, inf  ;;  %v1380_v33 = vand.u32 2147483648, %v1373_v28  ;;  %vm1379_vm11 = vcmp.eq.f32.partialorder %v1373_v28, 0.0 }
 0x7a5   :  { %v1372_v29 = vpop.xlane.xlu0 %1371 }
 0x7a6   :  { %v1374_v30 = vmul.f32 0.032258064, %v1372_v29 }
 0x7a8   :  { %3282 = vrsqrt.f32 %v1374_v30  ;;  %vm1384_vm12 = vcmp.eq.f32.partialorder %v1374_v30, inf  ;;  %v1387_v39 = vand.u32 2147483648, %v1374_v30  ;;  %vm1386_vm13 = vcmp.eq.f32.partialorder %v1374_v30, 0.0 }
 0x7a9   :  { %v1618_v10 = vpop.permute.xlu0 %1617 }
 0x7aa   :  { %v1623_v12 = vsel %vm256_vm6, %v1618_v10, 0 }
 0x7ad   :  { %v1720_v19 = vpop.permute.xlu0 %1719 }
 0x7ae   :  { %v1725_v24 = vsel %vm256_vm6, %v1720_v19, 0 }
 0x7b1   :  { %v3281_v31 = vpop.eup %3280 }
 0x7b2   :  { %v1376_v32 = vmul.f32 %v3281_v31, %v1373_v28 }
 0x7b4   :  { %v1378_v34 = vsel %vm1377_vm10, %v1373_v28, %v1376_v32 }
 0x7b5   :  { %v3283_v35 = vpop.eup %3282  ;;  %v1381_v36 = vsel %vm1379_vm11, %v1380_v33, %v1378_v34  ;;  %v1919_v33 = vlaneseq  ;;  %v136_v34 = vld [vmem:[%s3976_s3] sm:$0x1] }
 0x7b6   :  { %v1389_v37 = vadd.f32 1e-06, %v1381_v36  ;;  %v1383_v38 = vmul.f32 %v3283_v35, %v1374_v30  ;;  %vm138_vm14 = vcmp.eq.s32.totalorder %v136_v34, 0  ;;  %v137_v36 = vld [vmem:[%s3976_s3 + $0x1] sm:$0x1] }
 0x7b7   :  { %v1920_v35 = vshrl.u32 %v1919_v33, 7  ;;  %vm139_vm15 = vcmp.eq.s32.totalorder %v137_v36, 0 }
 0x7b8   :  { %3284 = vrcp.f32 %v1389_v37  ;;  %v1385_v41 = vsel %vm1384_vm12, %v1374_v30, %v1383_v38  ;;  %v140_v38 = vsel %vm138_vm14, -1e+09, %v3397_v17 }
 0x7b9   :  { %v1388_v42 = vsel %vm1386_vm13, %v1387_v39, %v1385_v41  ;;  %v1921_v37 = vsub.s32 0, %v1920_v35  ;;  %v141_v41 = vsel %vm139_vm15, -1e+09, %v3397_v17 }
 0x7ba   :  { %v1390_v43 = vadd.f32 1e-06, %v1388_v42 }
 0x7bb   :  { %v1922_v39 = vrot.slane %v140_v38, %v1921_v37 }
 0x7bc   :  { %3286 = vrcp.f32 %v1390_v43 }
 0x7c5   :  { %v3285_v44 = vpop.eup %3284 }
 0x7c6   :  { %v1393_v45 = vmul.f32 %v3285_v44, %v3717_v4  ;;  %v3740_v4 = vpack.c.bf16 %v1514_v2, %v1511_v60  ;;  %v1926_v44 = vrot.slane %v141_v41, %v1921_v37 }
 0x7c8   :  { %v1399_v48 = vmul.f32 %v2806_v40, %v1393_v45  ;;  %1669 = vrot.lane.b32.xlu1 %v3740_v4, %s3400_s5  ;;  %v1571_v56 = vsel %vm256_vm6, %v3740_v4, 0 }
 0x7c9   :  { %v3287_v46 = vpop.eup %3286  ;;  %3089 = vmatpush3.bf16.xpose.msra.mxu0 %v1571_v56 }
 0x7ca   :  { %v1394_v47 = vmul.f32 %v3287_v46, %v3722_v5  ;;  %v1405_v51 = vadd.f32 %v2807_v49, %v1399_v48  ;;  %v1525_v5 = vsel %vm256_vm6, %v3742_v0, 0  ;;  %3100 = vmatprep.subr.bf16.mxu0 %v3397_v17 }
 0x7cc   :  { %v1400_v50 = vmul.f32 %v2806_v40, %v1394_v47  ;;  %1769 = vrot.lane.b32.xlu1 %v3740_v4, %s3403_s18 }
 0x7ce   :  { %v1406_v53 = vadd.f32 %v2807_v49, %v1400_v50 }
 0x7d0   :  { %v1407_v54 = vpack.c.bf16 %v1406_v53, %v1405_v51 }
 0x7d2   :  { %3071 = vmatmul.mubr.msk.bf16.vlgmr.msra.gmra.mxu1 %vm148_vm0, %v1407_v54 }
 0x7d3   :  { %3084 = vmatprep.mubr.msk.bf16.mxu1 %vm3398_vm1, %v3397_v17  ;;  %3083 = vmatpush3.bf16.xpose.msra.mxu1 %v1525_v5 }
 0x7d4   :  { %3094 = vmatprep.subr.bf16.mxu1 %v3397_v17 }
 0x83a   :  { %v1670_v16 = vpop.permute.xlu1 %1669 }
 0x83b   :  { %v1675_v18 = vsel %vm256_vm6, %v1670_v16, 0 }
 0x83e   :  { %v1770_v20 = vpop.permute.xlu1 %1769 }
 0x83f   :  { %v1775_v22 = vsel %vm256_vm6, %v1770_v20, 0 }
 0x892   :  { %v1449_v6 = vpop.f32.mrf.mxu1 }
 0x893   :  { %v1450_v7 = vadd.f32 %v2808_v1, %v1449_v6 }
 0x894   :  { %v3072_v8 = vpop.f32.mrf.mxu1 }
 0x895   :  { %v1517_v9 = vpack.c.bf16 %v1450_v7, %v1450_v7 }
 0x896   :  { %v1452_v11 = vpop.f32.mrf.mxu1 }
 0x897   :  { %v1453_v13 = vadd.f32 %v2808_v1, %v1452_v11  ;;  %1717 = vrot.lane.b32.xlu0 %v1517_v9, %s3403_s18  ;;  %1614 = vrot.lane.b32.xlu1 %v1517_v9, %s3400_s5 }
 0x898   :  { %3085 = vmatmul.mubr.msk.bf16.vlgmr.msra.gmra.mxu1 %vm256_vm6, %v1517_v9  ;;  %v3073_v14 = vpop.f32.mrf.mxu1 }
 0x899   :  { %v1518_v15 = vpack.c.bf16 %v1453_v13, %v1453_v13  ;;  %3095 = vmatpush3.bf16.xpose.msra.mxu1 %v1623_v12  ;;  %3096 = vmatprep.mubr.msk.bf16.mxu1 %vm3398_vm1, %v3397_v17 }
 0x89a   :  { %3106 = vmatprep.subr.bf16.mxu1 %v3397_v17 }
 0x89b   :  { %1819 = vrot.lane.b32.xlu0 %v3742_v0, %s3405_s20  ;;  %1666 = vrot.lane.b32.xlu1 %v1518_v15, %s3400_s5 }
 0x89c   :  { %3091 = vmatmul.mubr.msk.bf16.vlgmr.msra.gmra.mxu0 %vm256_vm6, %v1518_v15 }
 0x89d   :  { %3101 = vmatpush3.bf16.xpose.msra.mxu0 %v1675_v18  ;;  %3102 = vmatprep.mubr.msk.bf16.mxu0 %vm3398_vm1, %v3397_v17 }
 0x89e   :  { %3112 = vmatprep.subr.bf16.mxu0 %v3397_v17 }
 0x89f   :  { %1817 = vrot.lane.b32.xlu0 %v1517_v9, %s3405_s20  ;;  %1767 = vrot.lane.b32.xlu1 %v1518_v15, %s3403_s18 }
 0x8a3   :  { %1869 = vrot.lane.b32.xlu1 %v3740_v4, %s3405_s20 }
 0x8a7   :  { %1867 = vrot.lane.b32.xlu1 %v1518_v15, %s3405_s20 }
 0x909   :  { %v1718_v21 = vpop.permute.xlu0 %1717  ;;  %v1615_v23 = vpop.permute.xlu1 %1614 }
 0x90a   :  { %3097 = vmatmul.mubr.msk.bf16.vlgmr.msra.gmra.mxu1 %vm256_vm6, %v1615_v23 }
 0x90b   :  { %3107 = vmatpush3.bf16.xpose.msra.mxu1 %v1725_v24  ;;  %3108 = vmatprep.mubr.msk.bf16.mxu1 %vm3398_vm1, %v3397_v17 }
 0x90c   :  { %3118 = vmatprep.subr.bf16.mxu1 %v3397_v17 }
 0x90d   :  { %v1667_v25 = vpop.permute.xlu1 %1666  ;;  %v1820_v26 = vpop.permute.xlu0 %1819 }
 0x90e   :  { %3103 = vmatmul.mubr.msk.bf16.vlgmr.msra.gmra.mxu0 %vm256_vm6, %v1667_v25  ;;  %v1825_v28 = vsel %vm256_vm6, %v1820_v26, 0 }
 0x90f   :  { %3113 = vmatpush3.bf16.xpose.msra.mxu0 %v1775_v22  ;;  %3114 = vmatprep.mubr.msk.bf16.mxu0 %vm3398_vm1, %v3397_v17 }
 0x910   :  { %3124 = vmatprep.subr.bf16.mxu0 %v3397_v17 }
 0x911   :  { %v1768_v27 = vpop.permute.xlu1 %1767  ;;  %v1818_v31 = vpop.permute.xlu0 %1817 }
 0x912   :  { %3109 = vmatmul.mubr.msk.bf16.vlgmr.msra.gmra.mxu1 %vm256_vm6, %v1718_v21 }
 0x913   :  { %3119 = vmatpush3.bf16.xpose.msra.mxu1 %v1825_v28  ;;  %3120 = vmatprep.mubr.msk.bf16.mxu1 %vm3398_vm1, %v3397_v17 }
 0x914   :  { %3130 = vmatprep.subr.bf16.mxu1 %v3397_v17 }
 0x915   :  { %v1870_v29 = vpop.permute.xlu1 %1869 }
 0x916   :  { %v1875_v30 = vsel %vm256_vm6, %v1870_v29, 0  ;;  %3115 = vmatmul.mubr.msk.bf16.vlgmr.msra.gmra.mxu0 %vm256_vm6, %v1768_v27 }
 0x917   :  { %3125 = vmatpush3.bf16.xpose.msra.mxu0 %v1875_v30  ;;  %3126 = vmatprep.mubr.msk.bf16.mxu0 %vm3398_vm1, %v3397_v17 }
 0x918   :  { %3136 = vmatprep.subr.bf16.mxu0 %v3397_v17 }
 0x919   :  { %v1868_v32 = vpop.permute.xlu1 %1867 }
 0x91a   :  { %3121 = vmatmul.mubr.msk.bf16.vlgmr.msra.gmra.mxu1 %vm256_vm6, %v1818_v31 }
 0x91b   :  { %3132 = vmatprep.mubr.msk.bf16.mxu1 %vm3398_vm1, %v3397_v17 }
 0x91e   :  { %3127 = vmatmul.mubr.msk.bf16.vlgmr.msra.gmra.mxu0 %vm256_vm6, %v1868_v32 }
 0x91f   :  { %3138 = vmatprep.mubr.msk.bf16.mxu0 %vm3398_vm1, %v3397_v17 }
 0x958   :  { %v1561_v42 = vpop.f32.mrf.mxu1 }
 0x959   :  { %v1929_v43 = vadd.f32 %v1922_v39, %v1561_v42 }
 0x95a   :  { %v3086_v45 = vpop.f32.mrf.mxu1 }
 0x95b   :  { %v1938_v40 = vsel %vm1937_vm2, %v1929_v43, -inf }
 0x95c   :  { %v1607_v46 = vpop.f32.mrf.mxu0  ;;  %1939 = vmax.xlane.f32.xlu0 %v1938_v40  ;;  %v1564_v47 = vpop.f32.mrf.mxu1 }
 0x95d   :  { %v1933_v48 = vadd.f32 %v1926_v44, %v1607_v46 }
 0x95e   :  { %v3087_v49 = vpop.f32.mrf.mxu1  ;;  %v3092_v50 = vpop.f32.mrf.mxu0 }
 0x95f   :  { %v1950_v51 = vsel %vm1937_vm2, %v1933_v48, -inf }
 0x960   :  { %1951 = vmax.xlane.f32.xlu1 %v1950_v51  ;;  %v1610_v53 = vpop.f32.mrf.mxu0 }
 0x962   :  { %v3093_v54 = vpop.f32.mrf.mxu0 }
 0x9ca   :  { %v1659_v55 = vpop.f32.mrf.mxu1 }
 0x9cb   :  { %v1930_v57 = vadd.f32 %v1922_v39, %v1659_v55 }
 0x9cc   :  { %v3098_v58 = vpop.f32.mrf.mxu1 }
 0x9cd   :  { %v1941_v60 = vsel %vm1937_vm2, %v1930_v57, -inf }
 0x9ce   :  { %v1711_v61 = vpop.f32.mrf.mxu0  ;;  %1942 = vmax.xlane.f32.xlu0 %v1941_v60  ;;  %v1662_v63 = vpop.f32.mrf.mxu1 }
 0x9cf   :  { %v3815_v2 = vadd.f32 %v1926_v44, %v1711_v61 }
 0x9d0   :  { %v3099_v3 = vpop.f32.mrf.mxu1  ;;  %v3104_v52 = vpop.f32.mrf.mxu0 }
 0x9d1   :  { %v1953_v56 = vsel %vm1937_vm2, %v3815_v2, -inf }
 0x9d2   :  { %v1714_v5 = vpop.f32.mrf.mxu0  ;;  %1954 = vmax.xlane.f32.xlu0 %v1953_v56  ;;  %v1761_v1 = vpop.f32.mrf.mxu1 }
 0x9d3   :  { %v3819_v6 = vadd.f32 %v1922_v39, %v1761_v1 }
 0x9d4   :  { %v3105_v7 = vpop.f32.mrf.mxu0  ;;  %v3110_v8 = vpop.f32.mrf.mxu1 }
 0x9d5   :  { %v1944_v9 = vsel %vm1937_vm2, %v3819_v6, -inf }
 0x9d6   :  { %v1811_v10 = vpop.f32.mrf.mxu0  ;;  %1945 = vmax.xlane.f32.xlu0 %v1944_v9  ;;  %v1764_v11 = vpop.f32.mrf.mxu1 }
 0x9d7   :  { %v1935_v12 = vadd.f32 %v1926_v44, %v1811_v10 }
 0x9d8   :  { %v3111_v13 = vpop.f32.mrf.mxu1  ;;  %v3116_v14 = vpop.f32.mrf.mxu0 }
 0x9d9   :  { %v1956_v15 = vsel %vm1937_vm2, %v1935_v12, -inf }
 0x9da   :  { %1957 = vmax.xlane.f32.xlu1 %v1956_v15  ;;  %v1814_v16 = vpop.f32.mrf.mxu0  ;;  %v1861_v18 = vpop.f32.mrf.mxu1 }
 0x9db   :  { %v3824_v19 = vadd.f32 %v1922_v39, %v1861_v18 }
 0x9dc   :  { %v3117_v20 = vpop.f32.mrf.mxu0  ;;  %v3122_v21 = vpop.f32.mrf.mxu1 }
 0x9dd   :  { %v1947_v23 = vsel %vm1937_vm2, %v3824_v19, -inf }
 0x9de   :  { %v1911_v24 = vpop.f32.mrf.mxu0  ;;  %1948 = vmax.xlane.f32.xlu0 %v1947_v23  ;;  %v1864_v25 = vpop.f32.mrf.mxu1 }
 0x9df   :  { %v1936_v32 = vadd.f32 %v1926_v44, %v1911_v24 }
 0x9e0   :  { %v3123_v22 = vpop.f32.mrf.mxu1  ;;  %v3128_v26 = vpop.f32.mrf.mxu0 }
 0x9e1   :  { %v1959_v34 = vsel %vm1937_vm2, %v1936_v32, -inf }
 0x9e2   :  { %v1914_v27 = vpop.f32.mrf.mxu0 }
 0x9e4   :  { %v3129_v28 = vpop.f32.mrf.mxu0 }
 0x9e5   :  { %v1940_v29 = vpop.xlane.xlu0 %1939 }
 0x9e6   :  { %v1962_v30 = vsub.f32 %v1929_v43, %v1940_v29 }
 0x9e8   :  { %v1970_v31 = vmul.f32 1.442695, %v1962_v30 }
 0x9e9   :  { %v1952_v36 = vpop.xlane.xlu1 %1951 }
 0x9ea   :  { %3288 = vpow2.f32 %v1970_v31  ;;  %v1966_v37 = vsub.f32 %v1933_v48, %v1952_v36 }
 0x9eb   :  { %2080 = vrot.lane.b32.xlu1 %v3740_v4, %s3399_s0 }
 0x9ec   :  { %v1978_v38 = vmul.f32 1.442695, %v1966_v37 }
 0x9ee   :  { %3290 = vpow2.f32 %v1978_v38 }
 0x9ef   :  { %2126 = vrot.lane.b32.xlu1 %v3742_v0, %s3402_s17 }
 0x9f4   :  { %2034 = vrot.lane.b32.xlu0 %v3742_v0, %s3399_s0 }
 0x9f7   :  { %v3834_v33 = vpop.eup %3288 }
 0x9f8   :  { %v1986_v35 = vsel %vm1937_vm2, %v3834_v33, 0.0 }
 0x9fb   :  { %v3841_v39 = vpop.eup %3290 }
 0x9fc   :  { %v1998_v41 = vsel %vm1937_vm2, %v3841_v39, 0.0 }
 0xa13   :  { %1960 = vmax.xlane.f32.xlu1 %v1959_v34  ;;  %1987 = vadd.xlane.f32.xlu0 %v1986_v35 }
 0xa24   :  { %2172 = vrot.lane.b32.xlu1 %v3740_v4, %s3402_s17 }
 0xa48   :  { %1999 = vadd.xlane.f32.xlu1 %v1998_v41 }
 0xa57   :  { %v1943_v42 = vpop.xlane.xlu0 %1942 }
 0xa58   :  { %v1963_v43 = vsub.f32 %v1930_v57, %v1943_v42 }
 0xa59   :  { %2264 = vrot.lane.b32.xlu1 %v3740_v4, %s3401_s16 }
 0xa5a   :  { %v1972_v44 = vmul.f32 1.442695, %v1963_v43 }
 0xa5b   :  { %v1955_v45 = vpop.xlane.xlu0 %1954 }
 0xa5c   :  { %3292 = vpow2.f32 %v1972_v44  ;;  %v1967_v47 = vsub.f32 %v3815_v2, %v1955_v45  ;;  %v91_v44 = vld [vmem:[#allocation4 + $0x80] sm:$0xff] }
 0xa5e   :  { %v1980_v50 = vmul.f32 1.442695, %v1967_v47  ;;  %v95_v47 = vpack.c.bf16 %v91_v44, %v91_v44 }
 0xa5f   :  { %v1946_v40 = vpop.xlane.xlu0 %1945 }
 0xa60   :  { %3294 = vpow2.f32 %v1980_v50  ;;  %v1964_v2 = vsub.f32 %v3819_v6, %v1946_v40 }
 0xa62   :  { %v1974_v3 = vmul.f32 1.442695, %v1964_v2  ;;  %v93_v2 = vld [vmem:[#allocation4 + $0x90] sm:$0xff] }
 0xa63   :  { %v1958_v46 = vpop.xlane.xlu1 %1957 }
 0xa64   :  { %v1968_v51 = vsub.f32 %v1935_v12, %v1958_v46 }
 0xa66   :  { %v1982_v57 = vmul.f32 1.442695, %v1968_v51 }
 0xa67   :  { %v2081_v48 = vpop.permute.xlu1 %2080  ;;  %v1949_v49 = vpop.xlane.xlu0 %1948 }
 0xa68   :  { %3137 = vmatpush3.bf16.msra.mxu0 %v2081_v48  ;;  %3296 = vpow2.f32 %v1982_v57  ;;  %v1965_v52 = vsub.f32 %v3824_v19, %v1949_v49  ;;  %v2410_v49 = vsel %vm761_vm9, %v95_v47, 0 }
 0xa69   :  { %v3293_v53 = vpop.eup %3292  ;;  %3148 = vmatprep.subr.bf16.mxu0 %v3397_v17  ;;  %3298 = vpow2.f32 %v1974_v3  ;;  %v97_v3 = vpack.c.bf16 %v93_v2, %v93_v2 }
 0xa6a   :  { %v1989_v54 = vsel %vm1937_vm2, %v3293_v53, 0.0  ;;  %v1976_v56 = vmul.f32 1.442695, %v1965_v52 }
 0xa6b   :  { %1990 = vadd.xlane.f32.xlu0 %v1989_v54  ;;  %v2035_v55 = vpop.permute.xlu0 %2034  ;;  %v2127_v5 = vpop.permute.xlu1 %2126  ;;  %v92_v54 = vld [vmem:[#allocation4 + $0x88] sm:$0xff] }
 0xa6c   :  { %3131 = vmatpush3.bf16.msra.mxu1 %v2035_v55  ;;  %3300 = vpow2.f32 %v1976_v56  ;;  %v96_v55 = vpack.c.bf16 %v92_v54, %v92_v54 }
 0xa6d   :  { %3142 = vmatprep.subr.bf16.mxu1 %v3397_v17  ;;  %v3851_v58 = vpop.eup %3294 }
 0xa6e   :  { %v2001_v60 = vsel %vm1937_vm2, %v3851_v58, 0.0  ;;  %v2457_v57 = vsel %vm761_vm9, %v96_v55, 0 }
 0xa75   :  { %v3855_v61 = vpop.eup %3296 }
 0xa76   :  { %v2004_v63 = vsel %vm1937_vm2, %v3855_v61, 0.0  ;;  %v3863_v1 = vpop.eup %3298 }
 0xa77   :  { %v1992_v11 = vsel %vm1937_vm2, %v3863_v1, 0.0 }
 0xa79   :  { %v3867_v12 = vpop.eup %3300 }
 0xa7a   :  { %v1995_v6 = vsel %vm1937_vm2, %v3867_v12, 0.0 }
 0xa7d   :  { %2002 = vadd.xlane.f32.xlu1 %v2001_v60 }
 0xa81   :  { %2005 = vadd.xlane.f32.xlu1 %v2004_v63  ;;  %2218 = vrot.lane.b32.xlu0 %v3742_v0, %s3401_s16 }
 0xa9c   :  { %v1961_v7 = vpop.xlane.xlu1 %1960  ;;  %v1988_v8 = vpop.xlane.xlu0 %1987 }
 0xa9d   :  { %v1969_v9 = vsub.f32 %v1936_v32, %v1961_v7  ;;  %3302 = vrcp.f32 %v1988_v8 }
 0xa9f   :  { %v1984_v10 = vmul.f32 1.442695, %v1969_v9 }
 0xaa0   :  { %1993 = vadd.xlane.f32.xlu0 %v1992_v11  ;;  %v2173_v19 = vpop.permute.xlu1 %2172 }
 0xaa1   :  { %3304 = vpow2.f32 %v1984_v10 }
 0xaa4   :  { %1996 = vadd.xlane.f32.xlu0 %v1995_v6  ;;  %v94_v6 = vld [vmem:[#allocation4 + $0x98] sm:$0xff] }
 0xaaa   :  { %v3303_v13 = vpop.eup %3302 }
 0xaab   :  { %v2018_v14 = vmul.f32 %v3303_v13, %v3834_v33  ;;  %v98_v13 = vpack.c.bf16 %v94_v6, %v94_v6 }
 0xaad   :  { %v2026_v15 = vpack.c.bf16 %v2018_v14, %v2018_v14 }
 0xaae   :  { %v3872_v16 = vpop.eup %3304 }
 0xaaf   :  { %3133 = vmatmul.mubr.msk.bf16.vlgmr.msra.gmra.mxu1 %vm1937_vm2, %v2026_v15  ;;  %v2007_v18 = vsel %vm1937_vm2, %v3872_v16, 0.0 }
 0xab0   :  { %3143 = vmatpush3.bf16.msra.mxu1 %v2127_v5  ;;  %2008 = vadd.xlane.f32.xlu1 %v2007_v18  ;;  %v2504_v5 = vsel %vm761_vm9, %v97_v3, 0 }
 0xab1   :  { %3144 = vmatprep.mubr.msk.bf16.mxu1 %vm3398_vm1, %v3397_v17  ;;  %3154 = vmatprep.subr.bf16.mxu1 %v3397_v17 }
 0xaba   :  { %2310 = vrot.lane.b32.xlu0 %v3742_v0, %s3404_s19 }
 0xac1   :  { %2356 = vrot.lane.b32.xlu1 %v3740_v4, %s3404_s19 }
 0xad1   :  { %v2000_v20 = vpop.xlane.xlu1 %1999 }
 0xad2   :  { %3306 = vrcp.f32 %v2000_v20 }
 0xad5   :  { %v2265_v22 = vpop.permute.xlu1 %2264 }
 0xadf   :  { %v3307_v21 = vpop.eup %3306 }
 0xae0   :  { %v2022_v23 = vmul.f32 %v3307_v21, %v3841_v39 }
 0xae2   :  { %v2030_v24 = vpack.c.bf16 %v2022_v23, %v2022_v23 }
 0xae4   :  { %3139 = vmatmul.mubr.msk.bf16.vlgmr.msra.gmra.mxu0 %vm1937_vm2, %v2030_v24 }
 0xae5   :  { %3149 = vmatpush3.bf16.msra.mxu0 %v2173_v19  ;;  %3150 = vmatprep.mubr.msk.bf16.mxu0 %vm3398_vm1, %v3397_v17 }
 0xae6   :  { %3160 = vmatprep.subr.bf16.mxu0 %v3397_v17 }
 0xaf4   :  { %v1991_v25 = vpop.xlane.xlu0 %1990 }
 0xaf5   :  { %3308 = vrcp.f32 %v1991_v25 }
 0xaf8   :  { %v2219_v28 = vpop.permute.xlu0 %2218 }
 0xb02   :  { %v3309_v0 = vpop.eup %3308 }
 0xb03   :  { %v2019_v4 = vmul.f32 %v3309_v0, %v3293_v53 }
 0xb05   :  { %v2027_v26 = vpack.c.bf16 %v2019_v4, %v2019_v4 }
 0xb06   :  { %v2003_v27 = vpop.xlane.xlu1 %2002 }
 0xb07   :  { %3310 = vrcp.f32 %v2003_v27  ;;  %3145 = vmatmul.mubr.msk.bf16.vlgmr.msra.gmra.mxu1 %vm1937_vm2, %v2027_v26 }
 0xb08   :  { %3155 = vmatpush3.bf16.msra.mxu1 %v2219_v28  ;;  %3156 = vmatprep.mubr.msk.bf16.mxu1 %vm3398_vm1, %v3397_v17 }
 0xb09   :  { %3166 = vmatprep.subr.bf16.mxu1 %v3397_v17 }
 0xb0a   :  { %v2006_v29 = vpop.xlane.xlu1 %2005 }
 0xb0b   :  { %3312 = vrcp.f32 %v2006_v29 }
 0xb14   :  { %v3311_v30 = vpop.eup %3310 }
 0xb15   :  { %v2023_v31 = vmul.f32 %v3311_v30, %v3851_v58 }
 0xb17   :  { %v2031_v32 = vpack.c.bf16 %v2023_v31, %v2023_v31 }
 0xb18   :  { %v3313_v33 = vpop.eup %3312 }
 0xb19   :  { %3151 = vmatmul.mubr.msk.bf16.vlgmr.msra.gmra.mxu0 %vm1937_vm2, %v2031_v32  ;;  %v2024_v34 = vmul.f32 %v3313_v33, %v3855_v61 }
 0xb1a   :  { %3161 = vmatpush3.bf16.msra.mxu0 %v2265_v22  ;;  %3162 = vmatprep.mubr.msk.bf16.mxu0 %vm3398_vm1, %v3397_v17 }
 0xb1b   :  { %3172 = vmatprep.subr.bf16.mxu0 %v3397_v17  ;;  %v2032_v35 = vpack.c.bf16 %v2024_v34, %v2024_v34 }
 0xb21   :  { %3163 = vmatmul.mubr.msk.bf16.vlgmr.msra.gmra.mxu0 %vm1937_vm2, %v2032_v35 }
 0xb22   :  { %3174 = vmatprep.mubr.msk.bf16.mxu0 %vm3398_vm1, %v3397_v17 }
 0xb29   :  { %v1994_v36 = vpop.xlane.xlu0 %1993 }
 0xb2a   :  { %3314 = vrcp.f32 %v1994_v36 }
 0xb2d   :  { %v1997_v37 = vpop.xlane.xlu0 %1996 }
 0xb2e   :  { %3316 = vrcp.f32 %v1997_v37 }
 0xb31   :  { %v2311_v45 = vpop.permute.xlu0 %2310 }
 0xb37   :  { %v3315_v38 = vpop.eup %3314 }
 0xb38   :  { %v2020_v39 = vmul.f32 %v3315_v38, %v3863_v1 }
 0xb39   :  { %v2009_v41 = vpop.xlane.xlu1 %2008 }
 0xb3a   :  { %3318 = vrcp.f32 %v2009_v41  ;;  %v2028_v42 = vpack.c.bf16 %v2020_v39, %v2020_v39 }
 0xb3b   :  { %v3317_v43 = vpop.eup %3316 }
 0xb3c   :  { %3157 = vmatmul.mubr.msk.bf16.vlgmr.msra.gmra.mxu1 %vm1937_vm2, %v2028_v42  ;;  %v2021_v46 = vmul.f32 %v3317_v43, %v3867_v12 }
 0xb3d   :  { %3167 = vmatpush3.bf16.msra.mxu1 %v2311_v45  ;;  %v2357_v40 = vpop.permute.xlu1 %2356  ;;  %3168 = vmatprep.mubr.msk.bf16.mxu1 %vm3398_vm1, %v3397_v17 }
 0xb3e   :  { %3173 = vmatpush3.bf16.msra.mxu0 %v2357_v40  ;;  %3178 = vmatprep.subr.bf16.mxu1 %v3397_v17  ;;  %v2029_v48 = vpack.c.bf16 %v2021_v46, %v2021_v46 }
 0xb3f   :  { %3184 = vmatprep.subr.bf16.mxu0 %v3397_v17 }
 0xb44   :  { %3169 = vmatmul.mubr.msk.bf16.vlgmr.msra.gmra.mxu1 %vm1937_vm2, %v2029_v48 }
 0xb45   :  { %3179 = vmatpush3.bf16.msra.mxu1 %v2410_v49  ;;  %3180 = vmatprep.mubr.msk.bf16.mxu1 %vm3398_vm1, %v3397_v17 }
 0xb46   :  { %3190 = vmatprep.subr.bf16.mxu1 %v3397_v17 }
 0xb47   :  { %v3319_v50 = vpop.eup %3318 }
 0xb48   :  { %v2025_v51 = vmul.f32 %v3319_v50, %v3872_v16  ;;  %v2551_v16 = vsel %vm761_vm9, %v98_v13, 0 }
 0xb4a   :  { %v2033_v53 = vpack.c.bf16 %v2025_v51, %v2025_v51 }
 0xb4c   :  { %3175 = vmatmul.mubr.msk.bf16.vlgmr.msra.gmra.mxu0 %vm1937_vm2, %v2033_v53 }
 0xb4d   :  { %3186 = vmatprep.mubr.msk.bf16.mxu0 %vm3398_vm1, %v3397_v17  ;;  %3185 = vmatpush3.bf16.msra.mxu0 %v2457_v57 }
 0xb4e   :  { %3196 = vmatprep.subr.bf16.mxu0 %v3397_v17 }
 0xb6f   :  { %v2074_v58 = vpop.f32.mrf.mxu1 }
 0xb71   :  { %v3134_v60 = vpop.f32.mrf.mxu1 }
 0xb73   :  { %v2077_v61 = vpop.f32.mrf.mxu1 }
 0xb74   :  { %v2833_v61 = vld [vmem:[#allocation6 + $0x8] ss:$0 sm:$0xff] }
 0xb75   :  { %v3135_v63 = vpop.f32.mrf.mxu1 }
 0xba4   :  { %v2120_v52 = vpop.f32.mrf.mxu0 }
 0xba5   :  { %v2402_v56 = vpack.c.bf16 %v2120_v52, %v2074_v58 }
 0xba6   :  { %v3140_v1 = vpop.f32.mrf.mxu0 }
 0xba7   :  { %3181 = vmatmul.mubr.msk.bf16.vlgmr.msra.gmra.mxu1 %vm256_vm6, %v2402_v56 }
 0xba8   :  { %v2123_v7 = vpop.f32.mrf.mxu0  ;;  %3191 = vmatpush3.bf16.msra.mxu1 %v2504_v5  ;;  %3192 = vmatprep.mubr.msk.bf16.mxu1 %vm3398_vm1, %v3397_v17 }
 0xba9   :  { %3202 = vmatprep.subr.bf16.mxu1 %v3397_v17 }
 0xbaa   :  { %v3141_v8 = vpop.f32.mrf.mxu0 }
 0xbc7   :  { %v2166_v9 = vpop.f32.mrf.mxu1 }
 0xbc9   :  { %v3146_v10 = vpop.f32.mrf.mxu1 }
 0xbcb   :  { %v2169_v11 = vpop.f32.mrf.mxu1 }
 0xbcd   :  { %v3147_v12 = vpop.f32.mrf.mxu1 }
 0xbd9   :  { %v2212_v14 = vpop.f32.mrf.mxu0 }
 0xbda   :  { %v2403_v15 = vpack.c.bf16 %v2212_v14, %v2166_v9 }
 0xbdb   :  { %v3152_v18 = vpop.f32.mrf.mxu0 }
 0xbdc   :  { %3187 = vmatmul.mubr.msk.bf16.vlgmr.msra.gmra.mxu0 %vm256_vm6, %v2403_v15 }
 0xbdd   :  { %v2215_v19 = vpop.f32.mrf.mxu0  ;;  %3197 = vmatpush3.bf16.msra.mxu0 %v2551_v16  ;;  %3198 = vmatprep.mubr.msk.bf16.mxu0 %vm3398_vm1, %v3397_v17 }
 0xbde   :  { %3210 = vmatprep.subr.bf16.mxu0 %v3397_v17 }
 0xbdf   :  { %v3153_v20 = vpop.f32.mrf.mxu0 }
 0xbe1   :  { %v2304_v21 = vpop.f32.mrf.mxu0 }
 0xbe3   :  { %v3164_v23 = vpop.f32.mrf.mxu0 }
 0xbe5   :  { %v2307_v24 = vpop.f32.mrf.mxu0 }
 0xbe6   :  { %v101_v24 = vld [vmem:[#allocation4 + $0xb0] sm:$0xff] }
 0xbe7   :  { %v3165_v25 = vpop.f32.mrf.mxu0 }
 0xbe8   :  { %v102_v25 = vld [vmem:[#allocation4 + $0xb8] sm:$0xff] }
 0xbfc   :  { %v2258_v0 = vpop.f32.mrf.mxu1 }
 0xbfd   :  { %v2404_v22 = vpack.c.bf16 %v2304_v21, %v2258_v0  ;;  %v99_v0 = vld [vmem:[#allocation4 + $0xa0] sm:$0xff] }
 0xbfe   :  { %v3158_v4 = vpop.f32.mrf.mxu1 }
 0xbff   :  { %3193 = vmatmul.mubr.msk.bf16.vlgmr.msra.gmra.mxu1 %vm256_vm6, %v2404_v22  ;;  %v104_v22 = vpack.c.bf16 %v102_v25, %v101_v24  ;;  %v100_v4 = vld [vmem:[#allocation4 + $0xa8] sm:$0xff] }
 0xc00   :  { %v2261_v26 = vpop.f32.mrf.mxu1  ;;  %3206 = vmatprep.mubr.msk.bf16.mxu1 %vm3398_vm1, %v3397_v17 }
 0xc01   :  { %3203 = vmatpush3.bf16.msra.mxu1 %v104_v22  ;;  %v103_v26 = vpack.c.bf16 %v100_v4, %v99_v0 }
 0xc02   :  { %v3159_v27 = vpop.f32.mrf.mxu1  ;;  %3204 = vmatprep.subr.bf16.mxu1 %v3397_v17 }
 0xc03   :  { %v111_v27 = vld [vmem:[#allocation4 + $0xf0] sm:$0xff] }
 0xc04   :  { %v2350_v28 = vpop.f32.mrf.mxu1 }
 0xc05   :  { %3205 = vmatpush3.bf16.msra.mxu1 %v103_v26 }
 0xc06   :  { %v3170_v29 = vpop.f32.mrf.mxu1 }
 0xc08   :  { %v2353_v30 = vpop.f32.mrf.mxu1 }
 0xc0a   :  { %v3171_v31 = vpop.f32.mrf.mxu1 }
 0xc0c   :  { %v2396_v32 = vpop.f32.mrf.mxu0 }
 0xc0d   :  { %v2405_v33 = vpack.c.bf16 %v2396_v32, %v2350_v28  ;;  %v112_v28 = vld [vmem:[#allocation4 + $0xf8] sm:$0xff] }
 0xc0e   :  { %v3176_v34 = vpop.f32.mrf.mxu0  ;;  %v116_v29 = vpack.c.bf16 %v112_v28, %v111_v27 }
 0xc0f   :  { %3199 = vmatmul.mubr.msk.bf16.vlgmr.msra.gmra.mxu0 %vm256_vm6, %v2405_v33  ;;  %vm2720_vm6 = vcmask 523264  }
 0xc10   :  { %v2399_v35 = vpop.f32.mrf.mxu0  ;;  %3218 = vmatprep.mubr.msk.bf16.mxu0 %vm3398_vm1, %v3397_v17  ;;  %3211 = vmatpush3.bf16.msra.mxu0 %v116_v29 }
 0xc11   :  { %3212 = vmatprep.subr.bf16.mxu0 %v3397_v17 }
 0xc12   :  { %v3177_v36 = vpop.f32.mrf.mxu0 }
 0xc67   :  { %v2446_v37 = vpop.f32.mrf.mxu1 }
 0xc68   :  { %v2594_v50 = vsel %vm148_vm0, %v2446_v37, 0.0 }
 0xc69   :  { %v3182_v38 = vpop.f32.mrf.mxu1 }
 0xc6b   :  { %v2449_v39 = vpop.f32.mrf.mxu1 }
 0xc6c   :  { %v2601_v58 = vsel %vm148_vm0, %v2449_v39, 0.0 }
 0xc6d   :  { %v3183_v41 = vpop.f32.mrf.mxu1 }
 0xc9c   :  { %v2493_v42 = vpop.f32.mrf.mxu0 }
 0xc9d   :  { %v2595_v49 = vsel %vm148_vm0, %v2493_v42, 0.0 }
 0xc9e   :  { %v3188_v43 = vpop.f32.mrf.mxu0  ;;  %v2596_v53 = vadd.f32 %v2595_v49, %v2594_v50 }
 0xca0   :  { %v2496_v44 = vpop.f32.mrf.mxu0 }
 0xca1   :  { %v2602_v54 = vsel %vm148_vm0, %v2496_v44, 0.0 }
 0xca2   :  { %v3189_v45 = vpop.f32.mrf.mxu0  ;;  %v2603_v2 = vadd.f32 %v2602_v54, %v2601_v58 }
 0xcbf   :  { %v2540_v40 = vpop.f32.mrf.mxu1 }
 0xcc0   :  { %v2597_v51 = vsel %vm148_vm0, %v2540_v40, 0.0 }
 0xcc1   :  { %v3194_v46 = vpop.f32.mrf.mxu1  ;;  %v2598_v55 = vadd.f32 %v2597_v51, %v2596_v53  ;;  %v2835_v53 = vld [vmem:[#allocation6 + $0xa] ss:$0 sm:$0xff] }
 0xcc3   :  { %v2543_v47 = vpop.f32.mrf.mxu1 }
 0xcc4   :  { %v2604_v60 = vsel %vm148_vm0, %v2543_v47, 0.0 }
 0xcc5   :  { %v3195_v48 = vpop.f32.mrf.mxu1  ;;  %v2605_v56 = vadd.f32 %v2604_v60, %v2603_v2  ;;  %v109_v60 = vld [vmem:[#allocation4 + $0xe0] sm:$0xff]  ;;  %v107_v2 = vld [vmem:[#allocation4 + $0xd0] sm:$0xff] }
 0xcc6   :  { %v2834_v48 = vld [vmem:[#allocation6 + $0x9] ss:$0 sm:$0xff] }
 0xccf   :  { %v2587_v57 = vpop.f32.mrf.mxu0 }
 0xcd0   :  { %v2599_v63 = vsel %vm148_vm0, %v2587_v57, 0.0 }
 0xcd1   :  { %v2600_v3 = vadd.f32 %v2599_v63, %v2598_v55  ;;  %v3200_v52 = vpop.f32.mrf.mxu0 }
 0xcd3   :  { %v2612_v5 = vadd.f32 %v2833_v61, %v2600_v3  ;;  %v2590_v1 = vpop.f32.mrf.mxu0  ;;  %v108_v3 = vld [vmem:[#allocation4 + $0xd8] sm:$0xff] }
 0xcd4   :  { %v2606_v7 = vsel %vm148_vm0, %v2590_v1, 0.0  ;;  %v114_v52 = vpack.c.bf16 %v108_v3, %v107_v2 }
 0xcd5   :  { %v2607_v8 = vadd.f32 %v2606_v7, %v2605_v56  ;;  %v3201_v9 = vpop.f32.mrf.mxu0  ;;  %v3945_v10 = vadd.f32 %v2612_v5, %v3707_v59  ;;  %v105_v56 = vld [vmem:[#allocation4 + $0xc0] sm:$0xff]  ;;  %v106_v5 = vld [vmem:[#allocation4 + $0xc8] sm:$0xff] }
 0xcd6   :  { %v113_v1 = vpack.c.bf16 %v106_v5, %v105_v56  ;;  %v2836_v7 = vld [vmem:[#allocation6 + $0xb] ss:$0 sm:$0xff] }
 0xcd7   :  { %v2613_v11 = vadd.f32 %v2833_v61, %v2607_v8  ;;  %v2616_v12 = vsel %vm148_vm0, %v3945_v10, 0.0  ;;  %v110_v61 = vld [vmem:[#allocation4 + $0xe8] sm:$0xff] }
 0xcd8   :  { %2617 = vadd.xlane.f32.xlu0 %v2616_v12  ;;  %v115_v63 = vpack.c.bf16 %v110_v61, %v109_v60 }
 0xcd9   :  { %v3950_v6 = vadd.f32 %v2613_v11, %v3712_v62 }
 0xcda   :  { %3213 = vmatpush3.bf16.msra.mxu0 %v115_v63 }
 0xcdb   :  { %v2619_v13 = vsel %vm148_vm0, %v3950_v6, 0.0  ;;  %3214 = vmatprep.subr.bf16.mxu0 %v3397_v17 }
 0xcdc   :  { %2620 = vadd.xlane.f32.xlu1 %v2619_v13 }
 0xcde   :  { %3215 = vmatpush3.bf16.msra.mxu0 %v114_v52 }
 0xcdf   :  { %3216 = vmatprep.subr.bf16.mxu0 %v3397_v17 }
 0xce2   :  { %3217 = vmatpush3.bf16.msra.mxu0 %v113_v1 }
 0xd61   :  { %v2618_v14 = vpop.xlane.xlu0 %2617 }
 0xd62   :  { %v2622_v15 = vmul.f32 0.03125, %v2618_v14 }
 0xd64   :  { %v2624_v16 = vsub.f32 %v3945_v10, %v2622_v15 }
 0xd65   :  { %v2621_v18 = vpop.xlane.xlu1 %2620 }
 0xd66   :  { %v2623_v19 = vmul.f32 0.03125, %v2621_v18  ;;  %v2626_v59 = vmul.f32 %v2624_v16, %v2624_v16 }
 0xd68   :  { %v2625_v20 = vsub.f32 %v3950_v6, %v2623_v19  ;;  %v2628_v21 = vsel %vm148_vm0, %v2626_v59, 0.0  ;;  %v2839_v19 = vld [vmem:[#allocation6 + $0xc] ss:$0 sm:$0xff] }
 0xd69   :  { %2629 = vadd.xlane.f32.xlu0 %v2628_v21 }
 0xd6a   :  { %v2627_v23 = vmul.f32 %v2625_v20, %v2625_v20 }
 0xd6c   :  { %v2631_v62 = vsel %vm148_vm0, %v2627_v23, 0.0 }
 0xd6d   :  { %2632 = vadd.xlane.f32.xlu0 %v2631_v62 }
 0xdf2   :  { %v2630_v30 = vpop.xlane.xlu0 %2629 }
 0xdf3   :  { %v2634_v31 = vmul.f32 0.032258064, %v2630_v30 }
 0xdf5   :  { %3320 = vrsqrt.f32 %v2634_v31  ;;  %vm2638_vm1 = vcmp.eq.f32.partialorder %v2634_v31, inf  ;;  %v2641_v36 = vand.u32 2147483648, %v2634_v31  ;;  %vm2640_vm3 = vcmp.eq.f32.partialorder %v2634_v31, 0.0 }
 0xdf6   :  { %v2633_v32 = vpop.xlane.xlu0 %2632 }
 0xdf7   :  { %v2635_v33 = vmul.f32 0.032258064, %v2633_v32 }
 0xdf9   :  { %3322 = vrsqrt.f32 %v2635_v33  ;;  %vm2645_vm4 = vcmp.eq.f32.partialorder %v2635_v33, inf  ;;  %v2648_v43 = vand.u32 2147483648, %v2635_v33  ;;  %vm2647_vm5 = vcmp.eq.f32.partialorder %v2635_v33, 0.0 }
 0xe02   :  { %v3321_v34 = vpop.eup %3320 }
 0xe03   :  { %v2637_v35 = vmul.f32 %v3321_v34, %v2634_v31 }
 0xe05   :  { %v2639_v37 = vsel %vm2638_vm1, %v2634_v31, %v2637_v35 }
 0xe06   :  { %v3323_v38 = vpop.eup %3322  ;;  %v2642_v39 = vsel %vm2640_vm3, %v2641_v36, %v2639_v37 }
 0xe07   :  { %v2650_v41 = vadd.f32 1e-06, %v2642_v39  ;;  %v2644_v42 = vmul.f32 %v3323_v38, %v2635_v33 }
 0xe09   :  { %3324 = vrcp.f32 %v2650_v41  ;;  %v2646_v44 = vsel %vm2645_vm4, %v2635_v33, %v2644_v42 }
 0xe0a   :  { %v2649_v45 = vsel %vm2647_vm5, %v2648_v43, %v2646_v44 }
 0xe0b   :  { %v2651_v40 = vadd.f32 1e-06, %v2649_v45 }
 0xe0d   :  { %3326 = vrcp.f32 %v2651_v40 }
 0xe16   :  { %v3325_v46 = vpop.eup %3324 }
 0xe17   :  { %v2654_v47 = vmul.f32 %v3325_v46, %v2624_v16 }
 0xe19   :  { %v2660_v51 = vmul.f32 %v2834_v48, %v2654_v47 }
 0xe1a   :  { %v3327_v49 = vpop.eup %3326 }
 0xe1b   :  { %v2655_v50 = vmul.f32 %v3327_v49, %v2625_v20  ;;  %v2666_v55 = vadd.f32 %v2835_v53, %v2660_v51 }
 0xe1d   :  { %v2661_v54 = vmul.f32 %v2834_v48, %v2655_v50 }
 0xe1f   :  { %v2667_v57 = vadd.f32 %v2835_v53, %v2661_v54 }
 0xe21   :  { %v2668_v58 = vpack.c.bf16 %v2667_v57, %v2666_v55 }
 0xe23   :  { %3207 = vmatmul.mubr.msk.bf16.vlgmr.msra.gmra.mxu1 %vm148_vm0, %v2668_v58 }
 0xee3   :  { %v2710_v8 = vpop.f32.mrf.mxu1 }
 0xee4   :  { %v2711_v11 = vadd.f32 %v2836_v7, %v2710_v8 }
 0xee5   :  { %v3208_v9 = vpop.f32.mrf.mxu1 }
 0xee6   :  { %v2717_v15 = vmax.f32 %v2711_v11, 0.0 }
 0xee7   :  { %v2713_v12 = vpop.f32.mrf.mxu1 }
 0xee8   :  { %v2714_v13 = vadd.f32 %v2836_v7, %v2713_v12 }
 0xee9   :  { %v3209_v14 = vpop.f32.mrf.mxu1 }
 0xeea   :  { %v2718_v16 = vmax.f32 %v2714_v13, 0.0 }
 0xeec   :  { %v2719_v18 = vpack.c.bf16 %v2718_v16, %v2717_v15 }
 0xeee   :  { %3219 = vmatmul.mubr.msk.bf16.vlgmr.msra.gmra.mxu0 %vm2720_vm6, %v2719_v18 }
 0xfae   :  { %v2758_v59 = vpop.f32.mrf.mxu0 }
 0xfaf   :  { %v2765_v17 = vadd.f32 %v2758_v59, %v3945_v10 }
 0xfb0   :  { %v3220_v20 = vpop.f32.mrf.mxu0 }
 0xfb1   :  { %v2771_v21 = vadd.f32 %v2839_v19, %v2765_v17 }
 0xfb2   :  { %v2761_v23 = vpop.f32.mrf.mxu0 }
 0xfb3   :  { %2773 = vst.msk [vmem:[%s3979_s6] sm:$0xff] %vm148_vm0, %v2771_v21  ;;  %v2766_v62 = vadd.f32 %v2761_v23, %v3950_v6 }
 0xfb4   :  { %v3221_v24 = vpop.f32.mrf.mxu0 }
 0xfb5   :  { %v2772_v25 = vadd.f32 %v2839_v19, %v2766_v62 }
 0xfb7   :  { %2774 = vst.msk [vmem:[%s3979_s6 + $0x8] sm:$0xff] %vm148_vm0, %v2772_v25 }
 0xfb8   :  { %2779 = vsyncpa [#allocation3], 1 }
 0xfb9   :  { %2780 = vsyncpa [#allocation5], 1 }

</bundles_post_ra>
